<compile_context>
chip_gen: v7x
topology: tpu7x:2x2x1
jax: 0.10.0
libtpu: 0.0.40
codegen_flags: <defaults>
</compile_context>

<pallas_src>
import numpy as np
import jax
import jax.numpy as jnp
from jax.experimental import pallas as pl
from jax.experimental.pallas import tpu as pltpu


# -----------------------------------------------------------------------------
# Pallas kernels (one batch sample per grid step)
# -----------------------------------------------------------------------------
def conv1_pool1_kernel(x_ref, p_ref, w_ref, b_ref, h1_ref, cnt_ref):
    """y1 count + conv1 + relu1 + pool1 + y2 count, fully fused.

    p_ref:  (1, 288, 50)  im2col patches, rows = (row-parity pr, i, j),
                          cols = (col-parity pc, 5x5 tap).
    w_ref:  (50, 12)      block-diagonal conv1 weight, lanes = (pc, out-ch).
    h1_ref: (1, 144, 6)   pooled output, rows = (i, j), lanes = channel.
    cnt_ref:(8, 128) i32  per-sample y1 + y2 (broadcast over the block).
    """
    y1 = jnp.sum((x_ref[0] != 0.0).astype(jnp.int32))

    a = jnp.dot(p_ref[0], w_ref[...], preferred_element_type=jnp.float32)
    a = jnp.maximum(a + b_ref[...], 0.0)                 # (288, 12) relu-conv1
    h = jnp.maximum(a[:, 0:6], a[:, 6:12])               # max over col-parity
    pooled = jnp.maximum(h[0:144, :], h[144:288, :])     # max over row-parity
    y2 = jnp.sum((pooled != 0.0).astype(jnp.int32))

    h1_ref[0] = pooled
    cnt_ref[...] = jnp.full(cnt_ref.shape, y1 + y2, dtype=jnp.int32)


def conv2_fc_kernel(p_ref, w2_ref, b2_ref, wf1_ref, bf1_ref, wf2_ref, bf2_ref,
                    wf3_ref, bf3_ref, out_ref, cnt_ref):
    """conv2+relu2+pool2 (+y3) and fc1/relu3 (+y4), fc2/relu4 (+y5), fc3/relu5.

    p_ref:  (1, 8, 360)   conv2 patches, rows = (row-parity pr, i), cols =
                          (h1-row-offset r, h1-col c, in-ch ci).
    w2_ref: (360, 128)    conv2 weight, lanes = (col-parity pc, j, out-ch co).
    wf1_ref:(4, 64, 120)  fc1 weight re-packed for the pool2 (i, j*16+co) layout.
    out_ref:(1, 1, 10)    relu5(fc3) logits for this sample.
    cnt_ref:(8, 128) i32  per-sample y3 + y4 + y5.
    """
    a = jnp.dot(p_ref[0], w2_ref[...], preferred_element_type=jnp.float32)
    a = jnp.maximum(a + b2_ref[...], 0.0)                # (8, 128) relu-conv2
    m = jnp.maximum(a[:, 0:64], a[:, 64:128])            # max over col-parity
    pooled = jnp.maximum(m[0:4, :], m[4:8, :])           # max over row-parity
    y3 = jnp.sum((pooled != 0.0).astype(jnp.int32))      # == count of flatten

    # fc1 over the (4, 64) pooled block: one small dot per pooled row.
    acc = bf1_ref[...]                                   # (1, 120)
    for i in range(4):
        acc = acc + jnp.dot(pooled[i:i + 1, :], wf1_ref[i],
                            preferred_element_type=jnp.float32)
    a1 = jnp.maximum(acc, 0.0)
    y4 = jnp.sum((a1 != 0.0).astype(jnp.int32))

    a2 = jnp.maximum(
        jnp.dot(a1, wf2_ref[...], preferred_element_type=jnp.float32)
        + bf2_ref[...], 0.0)
    y5 = jnp.sum((a2 != 0.0).astype(jnp.int32))

    a3 = jnp.maximum(
        jnp.dot(a2, wf3_ref[...], preferred_element_type=jnp.float32)
        + bf3_ref[...], 0.0)

    out_ref[0] = a3
    cnt_ref[...] = jnp.full(cnt_ref.shape, y3 + y4 + y5, dtype=jnp.int32)


# -----------------------------------------------------------------------------
# Pallas wrappers
# -----------------------------------------------------------------------------
def _conv1_pool1(xs, p1, w1b, b1b):
    batch = xs.shape[0]
    return pl.pallas_call(
        conv1_pool1_kernel,
        out_shape=(jax.ShapeDtypeStruct((batch, 144, 6), jnp.float32),
                   jax.ShapeDtypeStruct((batch * 8, 128), jnp.int32)),
        grid_spec=pltpu.PrefetchScalarGridSpec(
            num_scalar_prefetch=0,
            grid=(batch,),
            in_specs=[pl.BlockSpec((1, 28, 28), lambda b: (b, 0, 0)),
                      pl.BlockSpec((1, 288, 50), lambda b: (b, 0, 0)),
                      pl.BlockSpec((50, 12), lambda b: (0, 0)),
                      pl.BlockSpec((1, 12), lambda b: (0, 0))],
            out_specs=(pl.BlockSpec((1, 144, 6), lambda b: (b, 0, 0)),
                       pl.BlockSpec((8, 128), lambda b: (b, 0)))),
        compiler_params=pltpu.CompilerParams(
            dimension_semantics=("parallel",)),
    )(xs, p1, w1b, b1b)


def _conv2_fc(p2, params):
    batch = p2.shape[0]
    return pl.pallas_call(
        conv2_fc_kernel,
        out_shape=(jax.ShapeDtypeStruct((batch, 1, 10), jnp.float32),
                   jax.ShapeDtypeStruct((batch * 8, 128), jnp.int32)),
        grid_spec=pltpu.PrefetchScalarGridSpec(
            num_scalar_prefetch=0,
            grid=(batch,),
            in_specs=[pl.BlockSpec((1, 8, 360), lambda b: (b, 0, 0)),
                      pl.BlockSpec((360, 128), lambda b: (0, 0)),
                      pl.BlockSpec((1, 128), lambda b: (0, 0)),
                      pl.BlockSpec((4, 64, 120), lambda b: (0, 0, 0)),
                      pl.BlockSpec((1, 120), lambda b: (0, 0)),
                      pl.BlockSpec((120, 84), lambda b: (0, 0)),
                      pl.BlockSpec((1, 84), lambda b: (0, 0)),
                      pl.BlockSpec((84, 10), lambda b: (0, 0)),
                      pl.BlockSpec((1, 10), lambda b: (0, 0))],
            out_specs=(pl.BlockSpec((1, 1, 10), lambda b: (b, 0, 0)),
                       pl.BlockSpec((8, 128), lambda b: (b, 0)))),
        compiler_params=pltpu.CompilerParams(
            dimension_semantics=("parallel",)),
    )(p2, params["w2big"], params["b2big"],
      params["wf1"], params["bf1"], params["wf2"], params["bf2"],
      params["wf3"], params["bf3"])


# -----------------------------------------------------------------------------
# Forward pass (mirrors LeNet5.forward; counts are int32 instead of int64)
# -----------------------------------------------------------------------------
def lenet5_forward(params, x):
    batch = x.shape[0]
    xs = x.reshape(batch, 28, 28)

    # conv1 im2col: rows ordered (row-parity, i, j), cols (col-parity, 5x5 tap).
    pat = jnp.stack([xs[:, r:r + 24, s:s + 24]
                     for r in range(5) for s in range(5)], axis=-1)  # (B,24,24,25)
    pat = pat.reshape(batch, 12, 2, 12, 2, 25).transpose(0, 2, 1, 3, 4, 5)
    p1 = pat.reshape(batch, 288, 50)

    h1, cnt_a = _conv1_pool1(xs, p1, params["w1b"], params["b1b"])   # pallas 1

    # conv2 patches: row s = (pr, i) uses 5 consecutive pooled image rows.
    h1_img = h1.reshape(batch, 12, 12, 6)
    p2 = jnp.stack(
        [h1_img[:, (2 * (s % 4) + s // 4):(2 * (s % 4) + s // 4) + 5]
         .reshape(batch, 360) for s in range(8)], axis=1)            # (B,8,360)

    logits3, cnt_b = _conv2_fc(p2, params)                           # pallas 2
    logits = logits3.reshape(batch, 10)

    y = (jnp.sum(cnt_a.reshape(batch, 8, 128)[:, 0, 0])
         + jnp.sum(cnt_b.reshape(batch, 8, 128)[:, 0, 0]))
    return logits, y


# -----------------------------------------------------------------------------
# One-time weight packing (numpy, at init) + parameter init
# -----------------------------------------------------------------------------
def pack_params(raw):
    w1 = np.asarray(raw["conv1_w"], np.float32)   # (6,1,5,5)
    b1 = np.asarray(raw["conv1_b"], np.float32)
    w2 = np.asarray(raw["conv2_w"], np.float32)   # (16,6,5,5)
    b2 = np.asarray(raw["conv2_b"], np.float32)
    f1 = np.asarray(raw["fc1_w"], np.float32)     # (120,256)
    g1 = np.asarray(raw["fc1_b"], np.float32)
    f2 = np.asarray(raw["fc2_w"], np.float32)     # (84,120)
    g2 = np.asarray(raw["fc2_b"], np.float32)
    f3 = np.asarray(raw["fc3_w"], np.float32)     # (10,84)
    g3 = np.asarray(raw["fc3_b"], np.float32)

    # conv1: block-diagonal over col-parity -> (2*25, 2*6)
    w1m = w1.reshape(6, 25).T                     # [tap, co]
    w1b = np.zeros((50, 12), np.float32)
    w1b[0:25, 0:6] = w1m
    w1b[25:50, 6:12] = w1m
    b1b = np.tile(b1, 2)[None, :]                 # (1,12)

    # conv2: K = (r, c, ci) over 5 h1 rows x 12 cols x 6 ch; N = (pc, j, co).
    w2t = np.transpose(w2, (2, 3, 1, 0))          # (r, dj, ci, co)
    w2big = np.zeros((360, 128), np.float32)
    for pc in range(2):
        for j in range(4):
            for r in range(5):
                for dj in range(5):
                    c = 2 * j + pc + dj
                    w2big[r * 72 + c * 6: r * 72 + c * 6 + 6,
                          pc * 64 + j * 16: pc * 64 + j * 16 + 16] = w2t[r, dj]
    b2big = np.tile(b2, 8)[None, :]               # (1,128)

    # fc1: PyTorch flatten order is (co, i, j); kernel layout is (i, j*16+co).
    wf1 = np.transpose(f1.reshape(120, 16, 4, 4), (2, 3, 1, 0)).reshape(4, 64, 120)
    bf1 = g1[None, :]
    wf2, bf2 = f2.T, g2[None, :]                  # (120,84), (1,84)
    wf3, bf3 = f3.T, g3[None, :]                  # (84,10),  (1,10)

    packed = dict(w1b=w1b, b1b=b1b, w2big=w2big, b2big=b2big,
                  wf1=wf1, bf1=bf1, wf2=wf2, bf2=bf2, wf3=wf3, bf3=bf3)
    return {k: jnp.asarray(v) for k, v in packed.items()}


def init_params(key):
    ks = jax.random.split(key, 10)
    s = 0.1
    raw = {
        "conv1_w": jax.random.normal(ks[0], (6, 1, 5, 5), jnp.float32) * s,
        "conv1_b": jax.random.normal(ks[1], (6,), jnp.float32) * s,
        "conv2_w": jax.random.normal(ks[2], (16, 6, 5, 5), jnp.float32) * s,
        "conv2_b": jax.random.normal(ks[3], (16,), jnp.float32) * s,
        "fc1_w": jax.random.normal(ks[4], (120, 256), jnp.float32) * s,
        "fc1_b": jax.random.normal(ks[5], (120,), jnp.float32) * s,
        "fc2_w": jax.random.normal(ks[6], (84, 120), jnp.float32) * s,
        "fc2_b": jax.random.normal(ks[7], (84,), jnp.float32) * s,
        "fc3_w": jax.random.normal(ks[8], (10, 84), jnp.float32) * s,
        "fc3_b": jax.random.normal(ks[9], (10,), jnp.float32) * s,
    }
    return raw, pack_params(raw)


# -----------------------------------------------------------------------------
# Pure-JAX reference (for self-check only)
# -----------------------------------------------------------------------------
def lenet5_reference(raw, x):
    hi = jax.lax.Precision.HIGHEST

    def cnt(v):
        return jnp.sum((v != 0).astype(jnp.int32))

    y1 = cnt(x)
    a = jax.lax.conv_general_dilated(x, raw["conv1_w"], (1, 1), "VALID",
                                     dimension_numbers=("NCHW", "OIHW", "NCHW"),
                                     precision=hi)
    a = jax.nn.relu(a + raw["conv1_b"].reshape(1, -1, 1, 1))
    a = jax.lax.reduce_window(a, -jnp.inf, jax.lax.max,
                              (1, 1, 2, 2), (1, 1, 2, 2), "VALID")
    y2 = cnt(a)
    a = jax.lax.conv_general_dilated(a, raw["conv2_w"], (1, 1), "VALID",
                                     dimension_numbers=("NCHW", "OIHW", "NCHW"),
                                     precision=hi)
    a = jax.nn.relu(a + raw["conv2_b"].reshape(1, -1, 1, 1))
    a = jax.lax.reduce_window(a, -jnp.inf, jax.lax.max,
                              (1, 1, 2, 2), (1, 1, 2, 2), "VALID")
    a = a.reshape(x.shape[0], -1)
    y3 = cnt(a)
    a = jax.nn.relu(jnp.dot(a, raw["fc1_w"].T, precision=hi) + raw["fc1_b"])
    y4 = cnt(a)
    a = jax.nn.relu(jnp.dot(a, raw["fc2_w"].T, precision=hi) + raw["fc2_b"])
    y5 = cnt(a)
    a = jax.nn.relu(jnp.dot(a, raw["fc3_w"].T, precision=hi) + raw["fc3_b"])
    return a, y1 + y2 + y3 + y4 + y5


if __name__ == "__main__":
    key = jax.random.PRNGKey(0)
    pkey, xkey = jax.random.split(key)
    raw, params = init_params(pkey)
    # fc1 expects 256 flattened features => 28x28 MNIST input; small batch = 2.
    x = jax.random.normal(xkey, (2, 1, 28, 28), jnp.float32)

    logits, y = jax.jit(lenet5_forward)(params, x)
    jax.block_until_ready((logits, y))
    assert logits.shape == (2, 10)
    assert y.shape == ()

    # Self-check vs a plain-JAX reference (loose tolerance: MXU matmul rounding
    # can flip relu-boundary elements of the nonzero counts in rare cases).
    ref_logits, ref_y = jax.jit(lenet5_reference)(raw, x)
    jax.block_until_ready((ref_logits, ref_y))
    assert jnp.allclose(logits, ref_logits, atol=1e-1, rtol=1e-1), "logits mismatch"
    assert abs(int(y) - int(ref_y)) <= 64, f"count mismatch: {int(y)} vs {int(ref_y)}"

    print("KERNEL_OK")
</pallas_src>

<mosaic_0001>
module attributes {stable_mosaic.version = 11 : i64} {
  func.func @conv1_pool1_kernel(%arg0: i32, %arg1: memref<1x28x28xf32, #tpu.memory_space<vmem>>, %arg2: memref<1x288x50xf32, #tpu.memory_space<vmem>>, %arg3: memref<50x12xf32, #tpu.memory_space<vmem>>, %arg4: memref<1x12xf32, #tpu.memory_space<vmem>>, %arg5: memref<1x144x6xf32, #tpu.memory_space<vmem>>, %arg6: memref<8x128xi32, #tpu.memory_space<vmem>>) attributes {dimension_semantics = [#tpu.dimension_semantics<parallel>], iteration_bounds = array<i64: 2>, scalar_prefetch = 0 : i64, scratch_operands = 0 : i64, tpu.core_type = #tpu.core_type<tc>, window_params = [{transform_indices = @transform_0, window_bounds = array<i64: 1, 28, 28>}, {transform_indices = @transform_1, window_bounds = array<i64: 1, 288, 50>}, {pipeline_mode = #tpu.pipeline_mode<synchronous>, transform_indices = @transform_2, window_bounds = array<i64: 50, 12>}, {pipeline_mode = #tpu.pipeline_mode<synchronous>, transform_indices = @transform_3, window_bounds = array<i64: 1, 12>}, {transform_indices = @transform_4, window_bounds = array<i64: 1, 144, 6>}, {transform_indices = @transform_5, window_bounds = array<i64: 8, 128>}]} {
    %c0 = arith.constant 0 : index
    %c0_0 = arith.constant 0 : index
    %c0_1 = arith.constant 0 : index
    %0 = vector.load %arg1[%c0, %c0_0, %c0_1] : memref<1x28x28xf32, #tpu.memory_space<vmem>>, vector<1x28x28xf32>
    %1 = vector.shape_cast %0 : vector<1x28x28xf32> to vector<28x28xf32>
    %cst = arith.constant 0.000000e+00 : f32
    %2 = vector.broadcast %cst : f32 to vector<28x28xf32>
    %3 = arith.cmpf one, %1, %2 : vector<28x28xf32>
    %4 = arith.extui %3 : vector<28x28xi1> to vector<28x28xi32>
    %5 = vector.shape_cast %4 : vector<28x28xi32> to vector<1x28x28xi32>
    %cst_2 = arith.constant dense<0> : vector<1xi32>
    %6 = vector.multi_reduction <add>, %5, %cst_2 [1, 2] : vector<1x28x28xi32> to vector<1xi32>
    %7 = vector.shape_cast %6 : vector<1xi32> to vector<1x1x1xi32>
    %8 = vector.extract %7[0, 0, 0] : i32 from vector<1x1x1xi32>
    %c0_3 = arith.constant 0 : index
    %c0_4 = arith.constant 0 : index
    %c0_5 = arith.constant 0 : index
    %9 = vector.load %arg2[%c0_3, %c0_4, %c0_5] : memref<1x288x50xf32, #tpu.memory_space<vmem>>, vector<1x288x50xf32>
    %10 = vector.shape_cast %9 : vector<1x288x50xf32> to vector<288x50xf32>
    %c0_6 = arith.constant 0 : index
    %c0_7 = arith.constant 0 : index
    %11 = vector.load %arg3[%c0_6, %c0_7] : memref<50x12xf32, #tpu.memory_space<vmem>>, vector<50x12xf32>
    %cst_8 = arith.constant dense<0.000000e+00> : vector<288x12xf32>
    %12 = tpu.matmul %10, %11, %cst_8 {dimension_numbers = #tpu.dot_dimension_numbers<[1], [0], [0], [1], [0, 0, 1, 1], [], []>} : vector<288x50xf32>, vector<50x12xf32>, vector<288x12xf32> -> vector<288x12xf32>
    %c0_9 = arith.constant 0 : index
    %c0_10 = arith.constant 0 : index
    %13 = vector.load %arg4[%c0_9, %c0_10] : memref<1x12xf32, #tpu.memory_space<vmem>>, vector<1x12xf32>
    %14 = vector.broadcast %13 : vector<1x12xf32> to vector<288x12xf32>
    %15 = arith.addf %12, %14 : vector<288x12xf32>
    %cst_11 = arith.constant 0.000000e+00 : f32
    %16 = vector.broadcast %cst_11 : f32 to vector<288x12xf32>
    %17 = arith.maximumf %15, %16 : vector<288x12xf32>
    %18 = vector.extract_strided_slice %17 {offsets = [0, 0], sizes = [288, 6], strides = [1, 1]} : vector<288x12xf32> to vector<288x6xf32>
    %19 = vector.extract_strided_slice %17 {offsets = [0, 6], sizes = [288, 6], strides = [1, 1]} : vector<288x12xf32> to vector<288x6xf32>
    %20 = arith.maximumf %18, %19 : vector<288x6xf32>
    %21 = vector.extract_strided_slice %20 {offsets = [0, 0], sizes = [144, 6], strides = [1, 1]} : vector<288x6xf32> to vector<144x6xf32>
    %22 = vector.extract_strided_slice %20 {offsets = [144, 0], sizes = [144, 6], strides = [1, 1]} : vector<288x6xf32> to vector<144x6xf32>
    %23 = arith.maximumf %21, %22 : vector<144x6xf32>
    %cst_12 = arith.constant 0.000000e+00 : f32
    %24 = vector.broadcast %cst_12 : f32 to vector<144x6xf32>
    %25 = arith.cmpf one, %23, %24 : vector<144x6xf32>
    %26 = arith.extui %25 : vector<144x6xi1> to vector<144x6xi32>
    %27 = vector.shape_cast %26 : vector<144x6xi32> to vector<1x144x6xi32>
    %cst_13 = arith.constant dense<0> : vector<1xi32>
    %28 = vector.multi_reduction <add>, %27, %cst_13 [1, 2] : vector<1x144x6xi32> to vector<1xi32>
    %29 = vector.shape_cast %28 : vector<1xi32> to vector<1x1x1xi32>
    %30 = vector.extract %29[0, 0, 0] : i32 from vector<1x1x1xi32>
    %c0_14 = arith.constant 0 : index
    %c0_15 = arith.constant 0 : index
    %c0_16 = arith.constant 0 : index
    %31 = vector.load %arg5[%c0_14, %c0_15, %c0_16] : memref<1x144x6xf32, #tpu.memory_space<vmem>>, vector<1x144x6xf32>
    %32 = vector.shape_cast %31 : vector<1x144x6xf32> to vector<144x6xf32>
    %33 = vector.shape_cast %23 : vector<144x6xf32> to vector<1x144x6xf32>
    tpu.vector_store %arg5[%c0_14, %c0_15, %c0_16], %33 {strides = array<i32>} : memref<1x144x6xf32, #tpu.memory_space<vmem>>, vector<1x144x6xf32>,
    %34 = arith.addi %8, %30 : i32
    %35 = vector.broadcast %34 : i32 to vector<8x128xi32>
    %c0_17 = arith.constant 0 : index
    %c0_18 = arith.constant 0 : index
    %36 = vector.load %arg6[%c0_17, %c0_18] : memref<8x128xi32, #tpu.memory_space<vmem>>, vector<8x128xi32>
    tpu.vector_store %arg6[%c0_17, %c0_18], %35 {strides = array<i32>} : memref<8x128xi32, #tpu.memory_space<vmem>>, vector<8x128xi32>,
    return
  }
  func.func @transform_0(%arg0: i32) -> (i32, i32, i32) {
    %c0_i32 = arith.constant 0 : i32
    %c0_i32_0 = arith.constant 0 : i32
    %c0_i32_1 = arith.constant 0 : i32
    return %arg0, %c0_i32, %c0_i32_0 : i32, i32, i32
  }
  func.func @transform_1(%arg0: i32) -> (i32, i32, i32) {
    %c0_i32 = arith.constant 0 : i32
    %c0_i32_0 = arith.constant 0 : i32
    %c0_i32_1 = arith.constant 0 : i32
    return %arg0, %c0_i32, %c0_i32_0 : i32, i32, i32
  }
  func.func @transform_2(%arg0: i32) -> (i32, i32) {
    %c0_i32 = arith.constant 0 : i32
    %c0_i32_0 = arith.constant 0 : i32
    %c0_i32_1 = arith.constant 0 : i32
    return %c0_i32, %c0_i32_0 : i32, i32
  }
  func.func @transform_3(%arg0: i32) -> (i32, i32) {
    %c0_i32 = arith.constant 0 : i32
    %c0_i32_0 = arith.constant 0 : i32
    %c0_i32_1 = arith.constant 0 : i32
    return %c0_i32, %c0_i32_0 : i32, i32
  }
  func.func @transform_4(%arg0: i32) -> (i32, i32, i32) {
    %c0_i32 = arith.constant 0 : i32
    %c0_i32_0 = arith.constant 0 : i32
    %c0_i32_1 = arith.constant 0 : i32
    return %arg0, %c0_i32, %c0_i32_0 : i32, i32, i32
  }
  func.func @transform_5(%arg0: i32) -> (i32, i32) {
    %c0_i32 = arith.constant 0 : i32
    %c0_i32_0 = arith.constant 0 : i32
    return %arg0, %c0_i32 : i32, i32
  }
}

module attributes {stable_mosaic.version = 11 : i64} {
  func.func @conv2_fc_kernel(%arg0: i32, %arg1: memref<1x8x360xf32, #tpu.memory_space<vmem>>, %arg2: memref<360x128xf32, #tpu.memory_space<vmem>>, %arg3: memref<1x128xf32, #tpu.memory_space<vmem>>, %arg4: memref<4x64x120xf32, #tpu.memory_space<vmem>>, %arg5: memref<1x120xf32, #tpu.memory_space<vmem>>, %arg6: memref<120x84xf32, #tpu.memory_space<vmem>>, %arg7: memref<1x84xf32, #tpu.memory_space<vmem>>, %arg8: memref<84x10xf32, #tpu.memory_space<vmem>>, %arg9: memref<1x10xf32, #tpu.memory_space<vmem>>, %arg10: memref<1x1x10xf32, #tpu.memory_space<vmem>>, %arg11: memref<8x128xi32, #tpu.memory_space<vmem>>) attributes {dimension_semantics = [#tpu.dimension_semantics<parallel>], iteration_bounds = array<i64: 2>, scalar_prefetch = 0 : i64, scratch_operands = 0 : i64, tpu.core_type = #tpu.core_type<tc>, window_params = [{transform_indices = @transform_0, window_bounds = array<i64: 1, 8, 360>}, {pipeline_mode = #tpu.pipeline_mode<synchronous>, transform_indices = @transform_1, window_bounds = array<i64: 360, 128>}, {pipeline_mode = #tpu.pipeline_mode<synchronous>, transform_indices = @transform_2, window_bounds = array<i64: 1, 128>}, {pipeline_mode = #tpu.pipeline_mode<synchronous>, transform_indices = @transform_3, window_bounds = array<i64: 4, 64, 120>}, {pipeline_mode = #tpu.pipeline_mode<synchronous>, transform_indices = @transform_4, window_bounds = array<i64: 1, 120>}, {pipeline_mode = #tpu.pipeline_mode<synchronous>, transform_indices = @transform_5, window_bounds = array<i64: 120, 84>}, {pipeline_mode = #tpu.pipeline_mode<synchronous>, transform_indices = @transform_6, window_bounds = array<i64: 1, 84>}, {pipeline_mode = #tpu.pipeline_mode<synchronous>, transform_indices = @transform_7, window_bounds = array<i64: 84, 10>}, {pipeline_mode = #tpu.pipeline_mode<synchronous>, transform_indices = @transform_8, window_bounds = array<i64: 1, 10>}, {transform_indices = @transform_9, window_bounds = array<i64: 1, 1, 10>}, {transform_indices = @transform_10, window_bounds = array<i64: 8, 128>}]} {
    %c0 = arith.constant 0 : index
    %c0_0 = arith.constant 0 : index
    %c0_1 = arith.constant 0 : index
    %0 = vector.load %arg1[%c0, %c0_0, %c0_1] : memref<1x8x360xf32, #tpu.memory_space<vmem>>, vector<1x8x360xf32>
    %1 = vector.shape_cast %0 : vector<1x8x360xf32> to vector<8x360xf32>
    %c0_2 = arith.constant 0 : index
    %c0_3 = arith.constant 0 : index
    %2 = vector.load %arg2[%c0_2, %c0_3] : memref<360x128xf32, #tpu.memory_space<vmem>>, vector<360x128xf32>
    %cst = arith.constant dense<0.000000e+00> : vector<8x128xf32>
    %3 = tpu.matmul %1, %2, %cst {dimension_numbers = #tpu.dot_dimension_numbers<[1], [0], [0], [1], [0, 0, 1, 1], [], []>} : vector<8x360xf32>, vector<360x128xf32>, vector<8x128xf32> -> vector<8x128xf32>
    %c0_4 = arith.constant 0 : index
    %c0_5 = arith.constant 0 : index
    %4 = vector.load %arg3[%c0_4, %c0_5] : memref<1x128xf32, #tpu.memory_space<vmem>>, vector<1x128xf32>
    %5 = vector.broadcast %4 : vector<1x128xf32> to vector<8x128xf32>
    %6 = arith.addf %3, %5 : vector<8x128xf32>
    %cst_6 = arith.constant 0.000000e+00 : f32
    %7 = vector.broadcast %cst_6 : f32 to vector<8x128xf32>
    %8 = arith.maximumf %6, %7 : vector<8x128xf32>
    %9 = vector.extract_strided_slice %8 {offsets = [0, 0], sizes = [8, 64], strides = [1, 1]} : vector<8x128xf32> to vector<8x64xf32>
    %10 = vector.extract_strided_slice %8 {offsets = [0, 64], sizes = [8, 64], strides = [1, 1]} : vector<8x128xf32> to vector<8x64xf32>
    %11 = arith.maximumf %9, %10 : vector<8x64xf32>
    %12 = vector.extract_strided_slice %11 {offsets = [0, 0], sizes = [4, 64], strides = [1, 1]} : vector<8x64xf32> to vector<4x64xf32>
    %13 = vector.extract_strided_slice %11 {offsets = [4, 0], sizes = [4, 64], strides = [1, 1]} : vector<8x64xf32> to vector<4x64xf32>
    %14 = arith.maximumf %12, %13 : vector<4x64xf32>
    %cst_7 = arith.constant 0.000000e+00 : f32
    %15 = vector.broadcast %cst_7 : f32 to vector<4x64xf32>
    %16 = arith.cmpf one, %14, %15 : vector<4x64xf32>
    %17 = arith.extui %16 : vector<4x64xi1> to vector<4x64xi32>
    %18 = vector.shape_cast %17 : vector<4x64xi32> to vector<1x4x64xi32>
    %cst_8 = arith.constant dense<0> : vector<1xi32>
    %19 = vector.multi_reduction <add>, %18, %cst_8 [1, 2] : vector<1x4x64xi32> to vector<1xi32>
    %20 = vector.shape_cast %19 : vector<1xi32> to vector<1x1x1xi32>
    %21 = vector.extract %20[0, 0, 0] : i32 from vector<1x1x1xi32>
    %c0_9 = arith.constant 0 : index
    %c0_10 = arith.constant 0 : index
    %22 = vector.load %arg5[%c0_9, %c0_10] : memref<1x120xf32, #tpu.memory_space<vmem>>, vector<1x120xf32>
    %23 = vector.extract_strided_slice %14 {offsets = [0, 0], sizes = [1, 64], strides = [1, 1]} : vector<4x64xf32> to vector<1x64xf32>
    %c0_11 = arith.constant 0 : index
    %c0_12 = arith.constant 0 : index
    %c0_13 = arith.constant 0 : index
    %24 = vector.load %arg4[%c0_11, %c0_12, %c0_13] : memref<4x64x120xf32, #tpu.memory_space<vmem>>, vector<1x64x120xf32>
    %25 = vector.shape_cast %24 : vector<1x64x120xf32> to vector<64x120xf32>
    %cst_14 = arith.constant dense<0.000000e+00> : vector<1x120xf32>
    %26 = tpu.matmul %23, %25, %cst_14 {dimension_numbers = #tpu.dot_dimension_numbers<[1], [0], [0], [1], [0, 0, 1, 1], [], []>} : vector<1x64xf32>, vector<64x120xf32>, vector<1x120xf32> -> vector<1x120xf32>
    %27 = arith.addf %22, %26 : vector<1x120xf32>
    %28 = vector.extract_strided_slice %14 {offsets = [1, 0], sizes = [1, 64], strides = [1, 1]} : vector<4x64xf32> to vector<1x64xf32>
    %c1 = arith.constant 1 : index
    %c0_15 = arith.constant 0 : index
    %c0_16 = arith.constant 0 : index
    %29 = vector.load %arg4[%c1, %c0_15, %c0_16] : memref<4x64x120xf32, #tpu.memory_space<vmem>>, vector<1x64x120xf32>
    %30 = vector.shape_cast %29 : vector<1x64x120xf32> to vector<64x120xf32>
    %cst_17 = arith.constant dense<0.000000e+00> : vector<1x120xf32>
    %31 = tpu.matmul %28, %30, %cst_17 {dimension_numbers = #tpu.dot_dimension_numbers<[1], [0], [0], [1], [0, 0, 1, 1], [], []>} : vector<1x64xf32>, vector<64x120xf32>, vector<1x120xf32> -> vector<1x120xf32>
    %32 = arith.addf %27, %31 : vector<1x120xf32>
    %33 = vector.extract_strided_slice %14 {offsets = [2, 0], sizes = [1, 64], strides = [1, 1]} : vector<4x64xf32> to vector<1x64xf32>
    %c2 = arith.constant 2 : index
    %c0_18 = arith.constant 0 : index
    %c0_19 = arith.constant 0 : index
    %34 = vector.load %arg4[%c2, %c0_18, %c0_19] : memref<4x64x120xf32, #tpu.memory_space<vmem>>, vector<1x64x120xf32>
    %35 = vector.shape_cast %34 : vector<1x64x120xf32> to vector<64x120xf32>
    %cst_20 = arith.constant dense<0.000000e+00> : vector<1x120xf32>
    %36 = tpu.matmul %33, %35, %cst_20 {dimension_numbers = #tpu.dot_dimension_numbers<[1], [0], [0], [1], [0, 0, 1, 1], [], []>} : vector<1x64xf32>, vector<64x120xf32>, vector<1x120xf32> -> vector<1x120xf32>
    %37 = arith.addf %32, %36 : vector<1x120xf32>
    %38 = vector.extract_strided_slice %14 {offsets = [3, 0], sizes = [1, 64], strides = [1, 1]} : vector<4x64xf32> to vector<1x64xf32>
    %c3 = arith.constant 3 : index
    %c0_21 = arith.constant 0 : index
    %c0_22 = arith.constant 0 : index
    %39 = vector.load %arg4[%c3, %c0_21, %c0_22] : memref<4x64x120xf32, #tpu.memory_space<vmem>>, vector<1x64x120xf32>
    %40 = vector.shape_cast %39 : vector<1x64x120xf32> to vector<64x120xf32>
    %cst_23 = arith.constant dense<0.000000e+00> : vector<1x120xf32>
    %41 = tpu.matmul %38, %40, %cst_23 {dimension_numbers = #tpu.dot_dimension_numbers<[1], [0], [0], [1], [0, 0, 1, 1], [], []>} : vector<1x64xf32>, vector<64x120xf32>, vector<1x120xf32> -> vector<1x120xf32>
    %42 = arith.addf %37, %41 : vector<1x120xf32>
    %cst_24 = arith.constant 0.000000e+00 : f32
    %43 = vector.broadcast %cst_24 : f32 to vector<1x120xf32>
    %44 = arith.maximumf %42, %43 : vector<1x120xf32>
    %cst_25 = arith.constant 0.000000e+00 : f32
    %45 = vector.broadcast %cst_25 : f32 to vector<1x120xf32>
    %46 = arith.cmpf one, %44, %45 : vector<1x120xf32>
    %47 = arith.extui %46 : vector<1x120xi1> to vector<1x120xi32>
    %48 = vector.shape_cast %47 : vector<1x120xi32> to vector<1x1x120xi32>
    %cst_26 = arith.constant dense<0> : vector<1xi32>
    %49 = vector.multi_reduction <add>, %48, %cst_26 [1, 2] : vector<1x1x120xi32> to vector<1xi32>
    %50 = vector.shape_cast %49 : vector<1xi32> to vector<1x1x1xi32>
    %51 = vector.extract %50[0, 0, 0] : i32 from vector<1x1x1xi32>
    %c0_27 = arith.constant 0 : index
    %c0_28 = arith.constant 0 : index
    %52 = vector.load %arg6[%c0_27, %c0_28] : memref<120x84xf32, #tpu.memory_space<vmem>>, vector<120x84xf32>
    %cst_29 = arith.constant dense<0.000000e+00> : vector<1x84xf32>
    %53 = tpu.matmul %44, %52, %cst_29 {dimension_numbers = #tpu.dot_dimension_numbers<[1], [0], [0], [1], [0, 0, 1, 1], [], []>} : vector<1x120xf32>, vector<120x84xf32>, vector<1x84xf32> -> vector<1x84xf32>
    %c0_30 = arith.constant 0 : index
    %c0_31 = arith.constant 0 : index
    %54 = vector.load %arg7[%c0_30, %c0_31] : memref<1x84xf32, #tpu.memory_space<vmem>>, vector<1x84xf32>
    %55 = arith.addf %53, %54 : vector<1x84xf32>
    %cst_32 = arith.constant 0.000000e+00 : f32
    %56 = vector.broadcast %cst_32 : f32 to vector<1x84xf32>
    %57 = arith.maximumf %55, %56 : vector<1x84xf32>
    %cst_33 = arith.constant 0.000000e+00 : f32
    %58 = vector.broadcast %cst_33 : f32 to vector<1x84xf32>
    %59 = arith.cmpf one, %57, %58 : vector<1x84xf32>
    %60 = arith.extui %59 : vector<1x84xi1> to vector<1x84xi32>
    %61 = vector.shape_cast %60 : vector<1x84xi32> to vector<1x1x84xi32>
    %cst_34 = arith.constant dense<0> : vector<1xi32>
    %62 = vector.multi_reduction <add>, %61, %cst_34 [1, 2] : vector<1x1x84xi32> to vector<1xi32>
    %63 = vector.shape_cast %62 : vector<1xi32> to vector<1x1x1xi32>
    %64 = vector.extract %63[0, 0, 0] : i32 from vector<1x1x1xi32>
    %c0_35 = arith.constant 0 : index
    %c0_36 = arith.constant 0 : index
    %65 = vector.load %arg8[%c0_35, %c0_36] : memref<84x10xf32, #tpu.memory_space<vmem>>, vector<84x10xf32>
    %cst_37 = arith.constant dense<0.000000e+00> : vector<1x10xf32>
    %66 = tpu.matmul %57, %65, %cst_37 {dimension_numbers = #tpu.dot_dimension_numbers<[1], [0], [0], [1], [0, 0, 1, 1], [], []>} : vector<1x84xf32>, vector<84x10xf32>, vector<1x10xf32> -> vector<1x10xf32>
    %c0_38 = arith.constant 0 : index
    %c0_39 = arith.constant 0 : index
    %67 = vector.load %arg9[%c0_38, %c0_39] : memref<1x10xf32, #tpu.memory_space<vmem>>, vector<1x10xf32>
    %68 = arith.addf %66, %67 : vector<1x10xf32>
    %cst_40 = arith.constant 0.000000e+00 : f32
    %69 = vector.broadcast %cst_40 : f32 to vector<1x10xf32>
    %70 = arith.maximumf %68, %69 : vector<1x10xf32>
    %c0_41 = arith.constant 0 : index
    %c0_42 = arith.constant 0 : index
    %c0_43 = arith.constant 0 : index
    %71 = vector.load %arg10[%c0_41, %c0_42, %c0_43] : memref<1x1x10xf32, #tpu.memory_space<vmem>>, vector<1x1x10xf32>
    %72 = vector.shape_cast %71 : vector<1x1x10xf32> to vector<1x10xf32>
    %73 = vector.shape_cast %70 : vector<1x10xf32> to vector<1x1x10xf32>
    tpu.vector_store %arg10[%c0_41, %c0_42, %c0_43], %73 {strides = array<i32>} : memref<1x1x10xf32, #tpu.memory_space<vmem>>, vector<1x1x10xf32>,
    %74 = arith.addi %21, %51 : i32
    %75 = arith.addi %74, %64 : i32
    %76 = vector.broadcast %75 : i32 to vector<8x128xi32>
    %c0_44 = arith.constant 0 : index
    %c0_45 = arith.constant 0 : index
    %77 = vector.load %arg11[%c0_44, %c0_45] : memref<8x128xi32, #tpu.memory_space<vmem>>, vector<8x128xi32>
    tpu.vector_store %arg11[%c0_44, %c0_45], %76 {strides = array<i32>} : memref<8x128xi32, #tpu.memory_space<vmem>>, vector<8x128xi32>,
    return
  }
  func.func @transform_0(%arg0: i32) -> (i32, i32, i32) {
    %c0_i32 = arith.constant 0 : i32
    %c0_i32_0 = arith.constant 0 : i32
    %c0_i32_1 = arith.constant 0 : i32
    return %arg0, %c0_i32, %c0_i32_0 : i32, i32, i32
  }
  func.func @transform_1(%arg0: i32) -> (i32, i32) {
    %c0_i32 = arith.constant 0 : i32
    %c0_i32_0 = arith.constant 0 : i32
    %c0_i32_1 = arith.constant 0 : i32
    return %c0_i32, %c0_i32_0 : i32, i32
  }
  func.func @transform_2(%arg0: i32) -> (i32, i32) {
    %c0_i32 = arith.constant 0 : i32
    %c0_i32_0 = arith.constant 0 : i32
    %c0_i32_1 = arith.constant 0 : i32
    return %c0_i32, %c0_i32_0 : i32, i32
  }
  func.func @transform_3(%arg0: i32) -> (i32, i32, i32) {
    %c0_i32 = arith.constant 0 : i32
    %c0_i32_0 = arith.constant 0 : i32
    %c0_i32_1 = arith.constant 0 : i32
    %c0_i32_2 = arith.constant 0 : i32
    return %c0_i32, %c0_i32_0, %c0_i32_1 : i32, i32, i32
  }
  func.func @transform_4(%arg0: i32) -> (i32, i32) {
    %c0_i32 = arith.constant 0 : i32
    %c0_i32_0 = arith.constant 0 : i32
    %c0_i32_1 = arith.constant 0 : i32
    return %c0_i32, %c0_i32_0 : i32, i32
  }
  func.func @transform_5(%arg0: i32) -> (i32, i32) {
    %c0_i32 = arith.constant 0 : i32
    %c0_i32_0 = arith.constant 0 : i32
    %c0_i32_1 = arith.constant 0 : i32
    return %c0_i32, %c0_i32_0 : i32, i32
  }
  func.func @transform_6(%arg0: i32) -> (i32, i32) {
    %c0_i32 = arith.constant 0 : i32
    %c0_i32_0 = arith.constant 0 : i32
    %c0_i32_1 = arith.constant 0 : i32
    return %c0_i32, %c0_i32_0 : i32, i32
  }
  func.func @transform_7(%arg0: i32) -> (i32, i32) {
    %c0_i32 = arith.constant 0 : i32
    %c0_i32_0 = arith.constant 0 : i32
    %c0_i32_1 = arith.constant 0 : i32
    return %c0_i32, %c0_i32_0 : i32, i32
  }
  func.func @transform_8(%arg0: i32) -> (i32, i32) {
    %c0_i32 = arith.constant 0 : i32
    %c0_i32_0 = arith.constant 0 : i32
    %c0_i32_1 = arith.constant 0 : i32
    return %c0_i32, %c0_i32_0 : i32, i32
  }
  func.func @transform_9(%arg0: i32) -> (i32, i32, i32) {
    %c0_i32 = arith.constant 0 : i32
    %c0_i32_0 = arith.constant 0 : i32
    %c0_i32_1 = arith.constant 0 : i32
    return %arg0, %c0_i32, %c0_i32_0 : i32, i32, i32
  }
  func.func @transform_10(%arg0: i32) -> (i32, i32) {
    %c0_i32 = arith.constant 0 : i32
    %c0_i32_0 = arith.constant 0 : i32
    return %arg0, %c0_i32 : i32, i32
  }
}

</mosaic_0001>

<bundles_post_ra>
// kernel: lenet5_forward.2
= control target key start
LH: loop header
LB: loop body
LE: loop exit
PB: predicated region body
PF: predicated region fallthrough
CT: control target
= control target key end

     0   :  { %s1386_s18 = smov 0   ;;  %s1955_s0 = inlined_call_operand.vmem [shape: f32[2,28,28], index: 0, kind: input, shape index: {}]   ;;  %s1956_s1 = inlined_call_operand.vmem [shape: f32[2,288,50], index: 1, kind: input, shape index: {}]   ;;  %s1957_s2 = inlined_call_operand.vmem [shape: f32[50,12], index: 2, kind: input, shape index: {}]   ;;  %s1958_s3 = inlined_call_operand.vmem [shape: f32[1,12], index: 3, kind: input, shape index: {}]   ;;  %s1959_s4 = inlined_call_operand.vmem [shape: f32[2,144,6], index: 4, kind: output, shape index: {0}]   ;;  %s1960_s5 = inlined_call_operand.vmem [shape: s32[16,128], index: 5, kind: output, shape index: {1}]  }
   0x1 LB: > { %s1148_s19 = sadd.s32 4294967295, %s1352_s18   ;;  %p1152_p0 = scmp.ge.s32.totalorder %s1352_s18, 1  ;;  %s1352_s18 = sphi %s1386_s18, %s16_s18  }
   0x2   : > { %p200_p1 = scmp.lt.s32.totalorder %s1352_s18, 3 }
   0x4   : > { %p201_p2 = pnand %p1152_p0, %p200_p1 }
   0x5   : > { %v332_v0 = vld [vmem:[%s1957_s2] sm:$0xff] (!%p201_p2)  ;;  %v333_v1 = vld [vmem:[%s1957_s2 + $0x8] sm:$0xff] (!%p201_p2)  ;;  %v334_v2 = vld [vmem:[%s1957_s2 + $0x10] sm:$0xff] (!%p201_p2)  ;;  %p237_p3 = scmp.lt.s32.totalorder (!%p201_p2), %s1148_s19, 1  ;;  %vm346_vm0 = vcmask (!%p201_p2), 408576   ;;  %vm455_vm1 = vcmask (!%p201_p2), 1041408  }
   0x6   : > { %204 = sbr.rel (%p201_p2) target bundleno = 651 (0x28b), region = 36  ;;  %v1310_v3 = vpack.c.bf16 (!%p201_p2), %v333_v1, %v332_v0  ;;  %v335_v4 = vld [vmem:[%s1957_s2 + $0x18] sm:$0xff] (!%p201_p2)  ;;  %v336_v6 = vld [vmem:[%s1957_s2 + $0x20] sm:$0xff] (!%p201_p2)  ;;  %v337_v7 = vld [vmem:[%s1957_s2 + $0x28] sm:$0xff] (!%p201_p2)  ;;  %s1354_s15 = smov (!%p201_p2), 122   ;;  %vm268_vm6 = vcmask (!%p201_p2), 228352  }
   0x7   : > { %v1314_v5 = vpack.c.bf16 (!%p201_p2), %v335_v4, %v334_v2  ;;  %v1318_v8 = vpack.c.bf16 (!%p201_p2), %v337_v7, %v336_v6  ;;  %v338_v11 = vld [vmem:[%s1957_s2 + $0x30] sm:$0x3] (!%p201_p2)  ;;  %v1498_v46 = vld [vmem:[%s1958_s3] ss:$0 sm:$0xff] (!%p201_p2)  ;;  %vm272_vm7 = vcmask (!%p201_p2), 224256   ;;  %vm974_vm8 = vcmask (!%p201_p2), 48128  }
   0x8   : > { %1311 = vmatprep.subr.bf16.mxu0 (!%p201_p2), %v1310_v3  ;;  %1322 = vmatprep.subr.bf16.mxu1 (!%p201_p2), %v1310_v3 }
   0x9   : > { %1313 = vmatpush3.bf16.msra.mxu0 (!%p201_p2), %v1310_v3  ;;  %1326 = vmatpush3.bf16.msra.mxu1 (!%p201_p2), %v1310_v3 }
   0xa   : > { %1315 = vmatprep.subr.bf16.mxu0 (!%p201_p2), %v1314_v5  ;;  %1323 = vmatprep.subr.bf16.mxu1 (!%p201_p2), %v1314_v5 }
   0xd   : > { %s2017_s19 = smov (!%p237_p3, %s1148_s19), 1  ;;  %1317 = vmatpush3.bf16.msra.mxu0 %v1314_v5  ;;  %1327 = vmatpush3.bf16.msra.mxu1 %v1314_v5 }
   0xe   : > { %s1330_s7 = smul.u32 288, %s2017_s19  ;;  %1319 = vmatprep.subr.bf16.mxu0 %v1318_v8  ;;  %1324 = vmatprep.subr.bf16.mxu1 %v1318_v8  ;;  %s1198_s16 = sshll.u32 %s2017_s19, 5 }
   0xf   : > { %s241_s21 = scalar_lea.vmem %s1955_s0, %s1198_s16  ;;  %s1331_s22 = smul.u32 144, %s2017_s19 }
  0x10   : > { %s1418_s10 = scalar_lea.vmem %s1956_s1, %s1330_s7  ;;  %s1157_s26 = sshll.u32 %s2017_s19, 3 }
  0x11   : > { %v296_v9 = vld [vmem:[%s1418_s10] sm:$0xff]  ;;  %v314_v10 = vld [vmem:[%s1418_s10 + $0x90] sm:$0xff]  ;;  %1321 = vmatpush3.bf16.msra.mxu0 %v1318_v8  ;;  %1328 = vmatpush3.bf16.msra.mxu1 %v1318_v8  ;;  %v297_v12 = vld [vmem:[%s1418_s10 + $0x8] sm:$0xff]  ;;  %s1768_s25 = scalar_lea.vmem %s1959_s4, %s1331_s22  ;;  %s255_s30 = scalar_lea.vmem %s1960_s5, %s1157_s26 }
  0x12   : > { %1256 = vmatprep.mubr.msk.f32.mxu0 %vm346_vm0, %v296_v9  ;;  %1283 = vmatprep.mubr.msk.f32.mxu1 %vm346_vm0, %v314_v10  ;;  %v315_v13 = vld [vmem:[%s1418_s10 + $0x98] sm:$0xff]  ;;  %v298_v14 = vld [vmem:[%s1418_s10 + $0x10] sm:$0xff]  ;;  %v316_v15 = vld [vmem:[%s1418_s10 + $0xa0] sm:$0xff] }
  0x13   : > { %1254 = vmatprep.subr.msk.mxu0 %vm455_vm1, %v338_v11  ;;  %1325 = vmatprep.subr.msk.mxu1 %vm455_vm1, %v338_v11  ;;  %v299_v16 = vld [vmem:[%s1418_s10 + $0x18] sm:$0xff]  ;;  %v317_v17 = vld [vmem:[%s1418_s10 + $0xa8] sm:$0xff]  ;;  %v300_v18 = vld [vmem:[%s1418_s10 + $0x20] sm:$0xff] }
  0x14   : > { %v318_v19 = vld [vmem:[%s1418_s10 + $0xb0] sm:$0xff]  ;;  %v301_v20 = vld [vmem:[%s1418_s10 + $0x28] sm:$0xff]  ;;  %v319_v21 = vld [vmem:[%s1418_s10 + $0xb8] sm:$0xff] }
  0x15   : > { %1255 = vmatpush3.msk.msra.mxu0 %vm455_vm1, %v338_v11  ;;  %1329 = vmatpush3.msk.msra.mxu1 %vm455_vm1, %v338_v11  ;;  %v302_v22 = vld [vmem:[%s1418_s10 + $0x30] sm:$0xff]  ;;  %v320_v23 = vld [vmem:[%s1418_s10 + $0xc0] sm:$0xff]  ;;  %v303_v24 = vld [vmem:[%s1418_s10 + $0x38] sm:$0xff] }
  0x16   : > { %1257 = vmatmul.mubr.msk.f32.vlgmr.msra.gmra.mrb[0].mxu0 %vm346_vm0, %v297_v12  ;;  %1284 = vmatmul.mubr.msk.f32.vlgmr.msra.gmra.mrb[0].mxu1 %vm346_vm0, %v315_v13  ;;  %v321_v25 = vld [vmem:[%s1418_s10 + $0xc8] sm:$0xff]  ;;  %v304_v26 = vld [vmem:[%s1418_s10 + $0x40] sm:$0xff]  ;;  %v322_v27 = vld [vmem:[%s1418_s10 + $0xd0] sm:$0xff] }
  0x17   : > { %1259 = vmatprep.mubr.msk.f32.mxu0 %vm346_vm0, %v298_v14  ;;  %1286 = vmatprep.mubr.msk.f32.mxu1 %vm346_vm0, %v316_v15  ;;  %v305_v28 = vld [vmem:[%s1418_s10 + $0x48] sm:$0xff]  ;;  %v323_v29 = vld [vmem:[%s1418_s10 + $0xd8] sm:$0xff]  ;;  %v306_v30 = vld [vmem:[%s1418_s10 + $0x50] sm:$0xff] }
  0x18   : > { %v324_v31 = vld [vmem:[%s1418_s10 + $0xe0] sm:$0xff]  ;;  %v307_v32 = vld [vmem:[%s1418_s10 + $0x58] sm:$0xff]  ;;  %v325_v33 = vld [vmem:[%s1418_s10 + $0xe8] sm:$0xff] }
  0x19   : > { %v308_v34 = vld [vmem:[%s1418_s10 + $0x60] sm:$0xff]  ;;  %v326_v35 = vld [vmem:[%s1418_s10 + $0xf0] sm:$0xff]  ;;  %v309_v36 = vld [vmem:[%s1418_s10 + $0x68] sm:$0xff] }
  0x1a   : > { %1260 = vmatmul.mubr.msk.f32.gmra.mrb[2].mxu0 %vm346_vm0, %v299_v16  ;;  %1287 = vmatmul.mubr.msk.f32.gmra.mrb[2].mxu1 %vm346_vm0, %v317_v17  ;;  %v327_v37 = vld [vmem:[%s1418_s10 + $0xf8] sm:$0xff]  ;;  %v310_v38 = vld [vmem:[%s1418_s10 + $0x70] sm:$0xff]  ;;  %v328_v39 = vld [vmem:[%s1418_s10 + $0x100] sm:$0xff] }
  0x1b   : > { %1262 = vmatprep.mubr.msk.f32.mxu0 %vm346_vm0, %v300_v18  ;;  %1289 = vmatprep.mubr.msk.f32.mxu1 %vm346_vm0, %v318_v19  ;;  %v311_v40 = vld [vmem:[%s1418_s10 + $0x78] sm:$0xff]  ;;  %v329_v41 = vld [vmem:[%s1418_s10 + $0x108] sm:$0xff]  ;;  %v312_v42 = vld [vmem:[%s1418_s10 + $0x80] sm:$0xff] }
  0x1c   : > { %v330_v43 = vld [vmem:[%s1418_s10 + $0x110] sm:$0xff]  ;;  %v313_v44 = vld [vmem:[%s1418_s10 + $0x88] sm:$0xff]  ;;  %v331_v45 = vld [vmem:[%s1418_s10 + $0x118] sm:$0xff] }
  0x1e   : > { %1263 = vmatmul.mubr.msk.f32.gmra.mrb[4].mxu0 %vm346_vm0, %v301_v20  ;;  %1290 = vmatmul.mubr.msk.f32.gmra.mrb[4].mxu1 %vm346_vm0, %v319_v21 }
  0x1f   : > { %1265 = vmatprep.mubr.msk.f32.mxu0 %vm346_vm0, %v302_v22  ;;  %1292 = vmatprep.mubr.msk.f32.mxu1 %vm346_vm0, %v320_v23 }
  0x22   : > { %1266 = vmatmul.mubr.msk.f32.gmra.mrb[6].mxu0 %vm346_vm0, %v303_v24  ;;  %1293 = vmatmul.mubr.msk.f32.gmra.mrb[6].mxu1 %vm346_vm0, %v321_v25 }
  0x23   : > { %1268 = vmatprep.mubr.msk.f32.mxu0 %vm346_vm0, %v304_v26  ;;  %1295 = vmatprep.mubr.msk.f32.mxu1 %vm346_vm0, %v322_v27 }
  0x26   : > { %1269 = vmatmul.mubr.msk.f32.gmra.mrb[8].mxu0 %vm346_vm0, %v305_v28  ;;  %1296 = vmatmul.mubr.msk.f32.gmra.mrb[8].mxu1 %vm346_vm0, %v323_v29 }
  0x27   : > { %1271 = vmatprep.mubr.msk.f32.mxu0 %vm346_vm0, %v306_v30  ;;  %1298 = vmatprep.mubr.msk.f32.mxu1 %vm346_vm0, %v324_v31 }
  0x2a   : > { %1272 = vmatmul.mubr.msk.f32.gmra.mrb[10].mxu0 %vm346_vm0, %v307_v32  ;;  %1299 = vmatmul.mubr.msk.f32.gmra.mrb[10].mxu1 %vm346_vm0, %v325_v33 }
  0x2b   : > { %1274 = vmatprep.mubr.msk.f32.mxu0 %vm346_vm0, %v308_v34  ;;  %1301 = vmatprep.mubr.msk.f32.mxu1 %vm346_vm0, %v326_v35 }
  0x2e   : > { %1275 = vmatmul.mubr.msk.f32.gmra.mrb[12].mxu0 %vm346_vm0, %v309_v36  ;;  %1302 = vmatmul.mubr.msk.f32.gmra.mrb[12].mxu1 %vm346_vm0, %v327_v37 }
  0x2f   : > { %1277 = vmatprep.mubr.msk.f32.mxu0 %vm346_vm0, %v310_v38  ;;  %1304 = vmatprep.mubr.msk.f32.mxu1 %vm346_vm0, %v328_v39 }
  0x32   : > { %1278 = vmatmul.mubr.msk.f32.gmra.mrb[14].mxu0 %vm346_vm0, %v311_v40  ;;  %1305 = vmatmul.mubr.msk.f32.gmra.mrb[14].mxu1 %vm346_vm0, %v329_v41 }
  0x33   : > { %1280 = vmatprep.mubr.msk.f32.mxu0 %vm346_vm0, %v312_v42  ;;  %1307 = vmatprep.mubr.msk.f32.mxu1 %vm346_vm0, %v330_v43 }
  0x36   : > { %1281 = vmatmul.mubr.msk.f32.gmra.mrb[16].mxu0 %vm346_vm0, %v313_v44  ;;  %1308 = vmatmul.mubr.msk.f32.gmra.mrb[16].mxu1 %vm346_vm0, %v331_v45 }
  0xe9   : > { %v1258_v47 = vpop.f32.mrb[0].mxu0  ;;  %v1285_v48 = vpop.f32.mrb[0].mxu1 }
  0xea   : > { %v1501_v49 = vadd.f32 %v1258_v47, %v1498_v46  ;;  %v1504_v50 = vadd.f32 %v1285_v48, %v1498_v46  ;;  %v525_v51 = vpop.f32.mrb[1].mxu0  ;;  %v615_v52 = vpop.f32.mrb[1].mxu1 }
  0xeb   : > { %v1509_v55 = vadd.f32 %v1498_v46, %v525_v51  ;;  %v1525_v63 = vadd.f32 %v1498_v46, %v615_v52 }
  0xec   : > { %v705_v53 = vmax.f32 %v1501_v49, 0.0  ;;  %v723_v54 = vmax.f32 %v1504_v50, 0.0 }
  0xed   : > { %v1261_v56 = vpop.f32.mrb[2].mxu0  ;;  %v1288_v57 = vpop.f32.mrb[2].mxu1  ;;  %v704_v62 = vmax.f32 %v1509_v55, 0.0  ;;  %v722_v7 = vmax.f32 %v1525_v63, 0.0 }
  0xee   : > { %v1512_v58 = vadd.f32 %v1261_v56, %v1498_v46  ;;  %814 = vrot.lane.b32.xlu1 %v723_v54, %s1354_s15  ;;  %778 = vrot.lane.b32.xlu0 %v705_v53, %s1354_s15  ;;  %v535_v59 = vpop.f32.mrb[3].mxu0  ;;  %v1521_v60 = vadd.f32 %v1288_v57, %v1498_v46  ;;  %v625_v61 = vpop.f32.mrb[3].mxu1 }
  0xef   : > { %v1540_v8 = vadd.f32 %v1498_v46, %v535_v59  ;;  %v1554_v16 = vadd.f32 %v1498_v46, %v625_v61 }
  0xf0   : > { %v707_v0 = vmax.f32 %v1512_v58, 0.0  ;;  %v725_v3 = vmax.f32 %v1521_v60, 0.0 }
  0xf1   : > { %v1264_v1 = vpop.f32.mrb[4].mxu0  ;;  %v1291_v2 = vpop.f32.mrb[4].mxu1  ;;  %v706_v15 = vmax.f32 %v1540_v8, 0.0  ;;  %v724_v22 = vmax.f32 %v1554_v16, 0.0 }
  0xf2   : > { %782 = vrot.lane.b32.xlu1 %v707_v0, %s1354_s15  ;;  %776 = vrot.lane.b32.xlu0 %v704_v62, %s1354_s15  ;;  %v1536_v4 = vadd.f32 %v1264_v1, %v1498_v46  ;;  %v545_v5 = vpop.f32.mrb[5].mxu0  ;;  %v635_v6 = vpop.f32.mrb[5].mxu1  ;;  %v1550_v12 = vadd.f32 %v1291_v2, %v1498_v46 }
  0xf3   : > { %v1565_v23 = vadd.f32 %v1498_v46, %v545_v5  ;;  %v1568_v24 = vadd.f32 %v1498_v46, %v635_v6 }
  0xf4   : > { %v709_v11 = vmax.f32 %v1536_v4, 0.0  ;;  %v727_v19 = vmax.f32 %v1550_v12, 0.0 }
  0xf5   : > { %v1267_v9 = vpop.f32.mrb[6].mxu0  ;;  %v1294_v10 = vpop.f32.mrb[6].mxu1  ;;  %v1986_v31 = vmax.f32 %v1565_v23, 0.0  ;;  %v1985_v32 = vmax.f32 %v1568_v24, 0.0  ;;  %v1989_v4 = vmax.f32 %v1565_v23, 0.0 }
  0xf6   : > { %818 = vrot.lane.b32.xlu1 %v725_v3, %s1354_s15  ;;  %812 = vrot.lane.b32.xlu0 %v722_v7, %s1354_s15  ;;  %v555_v13 = vpop.f32.mrb[7].mxu0  ;;  %v645_v14 = vpop.f32.mrb[7].mxu1  ;;  %v1577_v27 = vadd.f32 %v1267_v9, %v1498_v46  ;;  %v1593_v37 = vadd.f32 %v1294_v10, %v1498_v46 }
  0xf7   : > { %v1580_v28 = vadd.f32 %v1498_v46, %v555_v13  ;;  %v1596_v38 = vadd.f32 %v1498_v46, %v645_v14 }
  0xf8   : > { %v1984_v35 = vmax.f32 %v1577_v27, 0.0  ;;  %v1982_v43 = vmax.f32 %v1593_v37, 0.0 }
  0xf9   : > { %v1270_v17 = vpop.f32.mrb[8].mxu0  ;;  %v1297_v18 = vpop.f32.mrb[8].mxu1  ;;  %v1983_v36 = vmax.f32 %v1580_v28, 0.0  ;;  %v1981_v44 = vmax.f32 %v1596_v38, 0.0  ;;  %v1992_v23 = vmax.f32 %v1580_v28, 0.0 }
  0xfa   : > { %786 = vrot.lane.b32.xlu1 %v709_v11, %s1354_s15  ;;  %780 = vrot.lane.b32.xlu0 %v706_v15, %s1354_s15  ;;  %v565_v20 = vpop.f32.mrb[9].mxu0  ;;  %v655_v21 = vpop.f32.mrb[9].mxu1  ;;  %v1607_v45 = vadd.f32 %v1270_v17, %v1498_v46  ;;  %v1613_v52 = vadd.f32 %v1297_v18, %v1498_v46 }
  0xfb   : > { %v1610_v47 = vadd.f32 %v1498_v46, %v565_v20  ;;  %v1616_v56 = vadd.f32 %v1498_v46, %v655_v21 }
  0xfc   : > { %v1980_v61 = vmax.f32 %v1607_v45, 0.0  ;;  %v1976_v14 = vmax.f32 %v1613_v52, 0.0  ;;  %v1995_v28 = vmax.f32 %v1607_v45, 0.0 }
  0xfd   : > { %v1273_v25 = vpop.f32.mrb[10].mxu0  ;;  %v1300_v26 = vpop.f32.mrb[10].mxu1  ;;  %v1979_v1 = vmax.f32 %v1610_v47, 0.0  ;;  %v1961_v17 = vmax.f32 %v1616_v56, 0.0 }
  0xfe   : > { %822 = vrot.lane.b32.xlu1 %v727_v19, %s1354_s15  ;;  %816 = vrot.lane.b32.xlu0 %v724_v22, %s1354_s15  ;;  %v575_v29 = vpop.f32.mrb[11].mxu0  ;;  %v665_v30 = vpop.f32.mrb[11].mxu1  ;;  %v1647_v18 = vadd.f32 %v1273_v25, %v1498_v46 }
  0xff   : > { %v1650_v20 = vadd.f32 %v1498_v46, %v575_v29  ;;  %v1664_v25 = vadd.f32 %v1498_v46, %v665_v30 }
 0x100   : > { %v1963_v21 = vmax.f32 %v1647_v18, 0.0 }
 0x101   : > { %v1276_v33 = vpop.f32.mrb[12].mxu0  ;;  %v1303_v34 = vpop.f32.mrb[12].mxu1 }
 0x102   : > { %784 = vrot.lane.b32.xlu1 %v1986_v31, %s1354_s15  ;;  %820 = vrot.lane.b32.xlu0 %v1985_v32, %s1354_s15  ;;  %v585_v39 = vpop.f32.mrb[13].mxu0  ;;  %v675_v40 = vpop.f32.mrb[13].mxu1 }
 0x105   : > { %v1279_v41 = vpop.f32.mrb[14].mxu0  ;;  %v1306_v42 = vpop.f32.mrb[14].mxu1 }
 0x106   : > { %790 = vrot.lane.b32.xlu1 %v1984_v35, %s1354_s15  ;;  %788 = vrot.lane.b32.xlu0 %v1983_v36, %s1354_s15  ;;  %v595_v48 = vpop.f32.mrb[15].mxu0  ;;  %v685_v51 = vpop.f32.mrb[15].mxu1 }
 0x109   : > { %v1282_v57 = vpop.f32.mrb[16].mxu0  ;;  %v1309_v59 = vpop.f32.mrb[16].mxu1 }
 0x10a   : > { %826 = vrot.lane.b32.xlu1 %v1982_v43, %s1354_s15  ;;  %824 = vrot.lane.b32.xlu0 %v1981_v44, %s1354_s15  ;;  %v1627_v2 = vadd.f32 %v1282_v57, %v1498_v46  ;;  %v605_v5 = vpop.f32.mrb[17].mxu0  ;;  %v1630_v6 = vadd.f32 %v1309_v59, %v1498_v46  ;;  %v695_v9 = vpop.f32.mrb[17].mxu1  ;;  %v1962_v57 = vmax.f32 %v1650_v20, 0.0  ;;  %v1661_v59 = vadd.f32 %v1300_v26, %v1498_v46 }
 0x10b   : > { %v1633_v10 = vadd.f32 %v1498_v46, %v605_v5  ;;  %v1636_v13 = vadd.f32 %v1498_v46, %v695_v9  ;;  %v1964_v5 = vmax.f32 %v1664_v25, 0.0  ;;  %v1675_v9 = vadd.f32 %v1276_v33, %v1498_v46 }
 0x10c   : > { %v1965_v29 = vmax.f32 %v1661_v59, 0.0  ;;  %v1678_v26 = vadd.f32 %v1498_v46, %v585_v39  ;;  %v1692_v33 = vadd.f32 %v1498_v46, %v675_v40 }
 0x10d   : > { %v1967_v30 = vmax.f32 %v1675_v9, 0.0 }
 0x10e   : > { %794 = vrot.lane.b32.xlu1 %v1980_v61, %s1354_s15  ;;  %792 = vrot.lane.b32.xlu0 %v1979_v1, %s1354_s15 }
 0x112   : > { %830 = vrot.lane.b32.xlu1 %v1976_v14, %s1354_s15  ;;  %828 = vrot.lane.b32.xlu0 %v1961_v17, %s1354_s15  ;;  %v1966_v17 = vmax.f32 %v1678_v26, 0.0 }
 0x116   : > { %798 = vrot.lane.b32.xlu1 %v1963_v21, %s1354_s15  ;;  %796 = vrot.lane.b32.xlu0 %v1962_v57, %s1354_s15  ;;  %v1689_v57 = vadd.f32 %v1303_v34, %v1498_v46  ;;  %v1968_v21 = vmax.f32 %v1692_v33, 0.0  ;;  %v1706_v34 = vadd.f32 %v1498_v46, %v595_v48 }
 0x118   : > { %v1975_v39 = vmax.f32 %v1689_v57, 0.0 }
 0x11a   : > { %834 = vrot.lane.b32.xlu1 %v1965_v29, %s1354_s15  ;;  %832 = vrot.lane.b32.xlu0 %v1964_v5, %s1354_s15  ;;  %v1703_v5 = vadd.f32 %v1279_v41, %v1498_v46  ;;  %v1972_v29 = vmax.f32 %v1706_v34, 0.0  ;;  %v1720_v41 = vadd.f32 %v1498_v46, %v685_v51  ;;  %v1978_v51 = vmax.f32 %v1636_v13, 0.0 }
 0x11c   : > { %v1974_v40 = vmax.f32 %v1703_v5, 0.0 }
 0x11e   : > { %802 = vrot.lane.b32.xlu1 %v1967_v30, %s1354_s15  ;;  %800 = vrot.lane.b32.xlu0 %v1966_v17, %s1354_s15  ;;  %v1717_v17 = vadd.f32 %v1306_v42, %v1498_v46  ;;  %v1969_v30 = vmax.f32 %v1720_v41, 0.0  ;;  %v1973_v42 = vmax.f32 %v1633_v10, 0.0  ;;  %v1977_v46 = vmax.f32 %v1630_v6, 0.0 }
 0x120   : > { %v1970_v48 = vmax.f32 %v1717_v17, 0.0 }
 0x122   : > { %838 = vrot.lane.b32.xlu1 %v1975_v39, %s1354_s15  ;;  %836 = vrot.lane.b32.xlu0 %v1968_v21, %s1354_s15  ;;  %v1971_v21 = vmax.f32 %v1627_v2, 0.0 }
 0x126   : > { %806 = vrot.lane.b32.xlu1 %v1974_v40, %s1354_s15  ;;  %804 = vrot.lane.b32.xlu0 %v1972_v29, %s1354_s15  ;;  %v259_v29 = vld [vmem:[%s241_s21 + $0x18] sm:$0xf] }
 0x127   : > { %vm263_vm5 = vcmp.ne.f32.partialorder %v259_v29, 0.0 }
 0x12a   : > { %842 = vrot.lane.b32.xlu1 %v1970_v48, %s1354_s15  ;;  %840 = vrot.lane.b32.xlu0 %v1969_v30, %s1354_s15  ;;  %v256_v30 = vld [vmem:[%s241_s21] sm:$0xff]  ;;  %v257_v48 = vld [vmem:[%s241_s21 + $0x8] sm:$0xff] }
 0x12b   : > { %vm260_vm2 = vcmp.ne.f32.partialorder %v256_v30, 0.0  ;;  %vm261_vm3 = vcmp.ne.f32.partialorder %v257_v48, 0.0 }
 0x12e   : > { %810 = vrot.lane.b32.xlu1 %v1971_v21, %s1354_s15  ;;  %808 = vrot.lane.b32.xlu0 %v1973_v42, %s1354_s15  ;;  %v258_v21 = vld [vmem:[%s241_s21 + $0x10] sm:$0xff]  ;;  %v1987_v42 = vmov 0  }
 0x12f   : > { %vm262_vm4 = vcmp.ne.f32.partialorder %v258_v21, 0.0  ;;  %v264_v40 = vsel %vm260_vm2, 1, %v1987_v42  ;;  %v265_v39 = vsel %vm261_vm3, 1, %v1987_v42 }
 0x130   : > { %v266_v14 = vsel %vm262_vm4, 1, %v1987_v42  ;;  %v270_v1 = vsel %vm268_vm6, %v265_v39, 0 }
 0x131   : > { %v271_v61 = vsel %vm268_vm6, %v266_v14, 0 }
 0x132   : > { %846 = vrot.lane.b32.xlu1 %v1977_v46, %s1354_s15  ;;  %844 = vrot.lane.b32.xlu0 %v1978_v51, %s1354_s15  ;;  %v267_v46 = vsel %vm263_vm5, 1, %v1987_v42  ;;  %v269_v51 = vsel %vm268_vm6, %v264_v40, 0 }
 0x133   : > { %v273_v44 = vsel %vm272_vm7, %v267_v46, 0  ;;  %v274_v30 = vadd.s32 %v270_v1, %v269_v51  ;;  %v1991_v51 = vmax.f32 %v1577_v27, 0.0 }
 0x134   : > { %v275_v48 = vadd.s32 %v273_v44, %v271_v61 }
 0x136   : > { %v276_v21 = vadd.s32 %v275_v48, %v274_v30 }
 0x138   : > { %v278_v29 = vshrl.u32 %v276_v21, 16  ;;  %v277_v36 = vand.u32 65535, %v276_v21 }
 0x13a   : > { %v280_v43 = vcvt.s32.f32 %v278_v29  ;;  %v279_v35 = vcvt.s32.f32 %v277_v36  ;;  %v1994_v29 = vmax.f32 %v1596_v38, 0.0  ;;  %v1997_v38 = vmax.f32 %v1613_v52, 0.0 }
 0x13b   : > { %v1999_v52 = vmax.f32 %v1647_v18, 0.0 }
 0x151   : > { %283 = vadd.xlane.f32.xlu0 %v280_v43 }
 0x155   : > { %281 = vadd.xlane.f32.xlu0 %v279_v35 }
 0x160   : > { %v815_v32 = vpop.permute.xlu1 %814  ;;  %v779_v31 = vpop.permute.xlu0 %778 }
 0x161   : > { %v903_v42 = vmax.f32 %v723_v54, %v815_v32  ;;  %v885_v39 = vmax.f32 %v705_v53, %v779_v31 }
 0x163   : > { %v1770_v36 = vmax.f32 %v885_v39, %v903_v42 }
 0x164   : > { %v783_v35 = vpop.permute.xlu1 %782  ;;  %v777_v43 = vpop.permute.xlu0 %776 }
 0x165   : > { %1030 = vst.msk [vmem:[%s1768_s25 + $0x8] sm:$0xff] %vm974_vm8, %v1770_v36  ;;  %v887_v49 = vmax.f32 %v707_v0, %v783_v35  ;;  %v884_v53 = vmax.f32 %v704_v62, %v777_v43  ;;  %vm939_vm9 = vcmp.ne.f32.partialorder %v1770_v36, 0.0  ;;  %v2006_v36 = vmax.f32 %v1692_v33, 0.0 }
 0x168   : > { %v819_v50 = vpop.permute.xlu1 %818  ;;  %v813_v54 = vpop.permute.xlu0 %812 }
 0x169   : > { %v905_v31 = vmax.f32 %v725_v3, %v819_v50  ;;  %v902_v32 = vmax.f32 %v722_v7, %v813_v54 }
 0x16b   : > { %v1783_v44 = vmax.f32 %v887_v49, %v905_v31  ;;  %v1785_v61 = vmax.f32 %v884_v53, %v902_v32 }
 0x16c   : > { %v787_v1 = vpop.permute.xlu1 %786  ;;  %v781_v14 = vpop.permute.xlu0 %780 }
 0x16d   : > { %1032 = vst.msk [vmem:[%s1768_s25 + $0x18] sm:$0xff] %vm974_vm8, %v1783_v44  ;;  %1029 = vst.msk [vmem:[%s1768_s25] sm:$0xff] %vm974_vm8, %v1785_v61  ;;  %v889_v60 = vmax.f32 %v709_v11, %v787_v1  ;;  %v886_v62 = vmax.f32 %v706_v15, %v781_v14  ;;  %v1990_v11 = vmax.f32 %v1568_v24, 0.0  ;;  %v1993_v24 = vmax.f32 %v1593_v37, 0.0 }
 0x16e   : > { %v1996_v37 = vmax.f32 %v1610_v47, 0.0  ;;  %v1998_v1 = vmax.f32 %v1616_v56, 0.0  ;;  %vm941_vm10 = vcmp.ne.f32.partialorder %v1783_v44, 0.0  ;;  %vm938_vm11 = vcmp.ne.f32.partialorder %v1785_v61, 0.0 }
 0x170   : > { %v823_v55 = vpop.permute.xlu1 %822  ;;  %v817_v58 = vpop.permute.xlu0 %816 }
 0x171   : > { %v907_v63 = vmax.f32 %v727_v19, %v823_v55  ;;  %v904_v0 = vmax.f32 %v724_v22, %v817_v58 }
 0x173   : > { %v1801_v3 = vmax.f32 %v889_v60, %v907_v63  ;;  %v1803_v7 = vmax.f32 %v886_v62, %v904_v0  ;;  %v2000_v63 = vmax.f32 %v1650_v20, 0.0 }
 0x174   : > { %v785_v40 = vpop.permute.xlu1 %784  ;;  %v821_v42 = vpop.permute.xlu0 %820 }
 0x175   : > { %1034 = vst.msk [vmem:[%s1768_s25 + $0x28] sm:$0xff] %vm974_vm8, %v1801_v3  ;;  %1031 = vst.msk [vmem:[%s1768_s25 + $0x10] sm:$0xff] %vm974_vm8, %v1803_v7  ;;  %v888_v8 = vmax.f32 %v1989_v4, %v785_v40  ;;  %v906_v12 = vmax.f32 %v1990_v11, %v821_v42  ;;  %v2001_v40 = vmax.f32 %v1661_v59, 0.0  ;;  %v2002_v4 = vmax.f32 %v1664_v25, 0.0 }
 0x176   : > { %vm943_vm12 = vcmp.ne.f32.partialorder %v1801_v3, 0.0  ;;  %v2003_v59 = vmax.f32 %v1675_v9, 0.0  ;;  %vm940_vm13 = vcmp.ne.f32.partialorder %v1803_v7, 0.0 }
 0x177   : > { %v1815_v15 = vmax.f32 %v888_v8, %v906_v12 }
 0x178   : > { %v791_v16 = vpop.permute.xlu1 %790  ;;  %v789_v19 = vpop.permute.xlu0 %788 }
 0x179   : > { %1033 = vst.msk [vmem:[%s1768_s25 + $0x20] sm:$0xff] %vm974_vm8, %v1815_v15  ;;  %v891_v30 = vmax.f32 %v1991_v51, %v791_v16  ;;  %v890_v48 = vmax.f32 %v1992_v23, %v789_v19  ;;  %v2005_v51 = vmax.f32 %v1689_v57, 0.0  ;;  %v2007_v23 = vmov 0  }
 0x17a   : > { %v957_v61 = vsel %vm939_vm9, 1, %v2007_v23  ;;  %v959_v3 = vsel %vm941_vm10, 1, %v2007_v23  ;;  %v956_v9 = vsel %vm938_vm11, 1, %v2007_v23  ;;  %vm942_vm14 = vcmp.ne.f32.partialorder %v1815_v15, 0.0 }
 0x17b   : > { %v976_v33 = vsel %vm974_vm8, %v957_v61, 0  ;;  %v958_v7 = vsel %vm940_vm13, 1, %v2007_v23  ;;  %v960_v15 = vsel %vm942_vm14, 1, %v2007_v23 }
 0x17c   : > { %v827_v22 = vpop.permute.xlu1 %826  ;;  %v825_v46 = vpop.permute.xlu0 %824 }
 0x17d   : > { %v909_v21 = vmax.f32 %v1993_v24, %v827_v22  ;;  %v908_v39 = vmax.f32 %v1994_v29, %v825_v46  ;;  %v2004_v22 = vmax.f32 %v1678_v26, 0.0  ;;  %v978_v29 = vsel %vm974_vm8, %v959_v3, 0 }
 0x17f   : > { %v927_v35 = vmax.f32 %v891_v30, %v909_v21  ;;  %v926_v43 = vmax.f32 %v890_v48, %v908_v39  ;;  %v961_v21 = vsel %vm943_vm12, 1, %v2007_v23  ;;  %v975_v39 = vsel %vm974_vm8, %v956_v9, 0 }
 0x180   : > { %v795_v50 = vpop.permute.xlu1 %794  ;;  %v793_v54 = vpop.permute.xlu0 %792 }
 0x181   : > { %1036 = vst.msk [vmem:[%s1768_s25 + $0x38] sm:$0xff] %vm974_vm8, %v927_v35  ;;  %1035 = vst.msk [vmem:[%s1768_s25 + $0x30] sm:$0xff] %vm974_vm8, %v926_v43  ;;  %v893_v53 = vmax.f32 %v1995_v28, %v795_v50  ;;  %v892_v31 = vmax.f32 %v1996_v37, %v793_v54  ;;  %vm945_vm15 = vcmp.ne.f32.partialorder %v927_v35, 0.0  ;;  %vm944_vm0 = vcmp.ne.f32.partialorder %v926_v43, 0.0 }
 0x182   : > { %v981_v50 = vsel %vm974_vm8, %v961_v21, 0  ;;  %v963_v54 = vsel %vm945_vm15, 1, %v2007_v23  ;;  %v962_v35 = vsel %vm944_vm0, 1, %v2007_v23 }
 0x184   : > { %v831_v27 = vpop.permute.xlu1 %830  ;;  %v829_v49 = vpop.permute.xlu0 %828 }
 0x185   : > { %v911_v32 = vmax.f32 %v1997_v38, %v831_v27  ;;  %v910_v14 = vmax.f32 %v1998_v1, %v829_v49  ;;  %v2008_v49 = vmax.f32 %v1703_v5, 0.0  ;;  %v985_v5 = vsel %vm974_vm8, %v963_v54, 0 }
 0x187   : > { %v1840_v55 = vmax.f32 %v893_v53, %v911_v32  ;;  %v1842_v58 = vmax.f32 %v892_v31, %v910_v14  ;;  %v2009_v53 = vmax.f32 %v1706_v34, 0.0  ;;  %v2010_v31 = vmax.f32 %v1717_v17, 0.0 }
 0x188   : > { %v799_v60 = vpop.permute.xlu1 %798  ;;  %v797_v62 = vpop.permute.xlu0 %796  ;;  %v2011_v32 = vmax.f32 %v1720_v41, 0.0  ;;  %v977_v14 = vsel %vm974_vm8, %v958_v7, 0 }
 0x189   : > { %1038 = vst.msk [vmem:[%s1768_s25 + $0x48] sm:$0xff] %vm974_vm8, %v1840_v55  ;;  %1037 = vst.msk [vmem:[%s1768_s25 + $0x40] sm:$0xff] %vm974_vm8, %v1842_v58  ;;  %v895_v56 = vmax.f32 %v1999_v52, %v799_v60  ;;  %v894_v0 = vmax.f32 %v2000_v63, %v797_v62  ;;  %vm947_vm1 = vcmp.ne.f32.partialorder %v1840_v55, 0.0  ;;  %vm946_vm2 = vcmp.ne.f32.partialorder %v1842_v58, 0.0 }
 0x18a   : > { %v979_v60 = vsel %vm974_vm8, %v960_v15, 0  ;;  %v983_v62 = vsel %vm974_vm8, %v962_v35, 0  ;;  %v965_v17 = vsel %vm947_vm1, 1, %v2007_v23  ;;  %v964_v41 = vsel %vm946_vm2, 1, %v2007_v23 }
 0x18b   : > { %v982_v55 = vadd.s32 %v981_v50, %v976_v33  ;;  %v989_v58 = vsel %vm974_vm8, %v965_v17, 0 }
 0x18c   : > { %v835_v45 = vpop.permute.xlu1 %834  ;;  %v833_v47 = vpop.permute.xlu0 %832 }
 0x18d   : > { %v913_v42 = vmax.f32 %v2001_v40, %v835_v45  ;;  %v912_v8 = vmax.f32 %v2002_v4, %v833_v47  ;;  %v986_v40 = vadd.s32 %v985_v5, %v978_v29  ;;  %v987_v4 = vsel %vm974_vm8, %v964_v41, 0 }
 0x18e   : > { %v990_v3 = vadd.s32 %v989_v58, %v982_v55 }
 0x18f   : > { %v931_v11 = vmax.f32 %v895_v56, %v913_v42  ;;  %v930_v12 = vmax.f32 %v894_v0, %v912_v8  ;;  %v980_v0 = vadd.s32 %v979_v60, %v975_v39  ;;  %v984_v42 = vadd.s32 %v983_v62, %v977_v14 }
 0x190   : > { %v803_v16 = vpop.permute.xlu1 %802  ;;  %v801_v19 = vpop.permute.xlu0 %800 }
 0x191   : > { %1040 = vst.msk [vmem:[%s1768_s25 + $0x58] sm:$0xff] %vm974_vm8, %v931_v11  ;;  %1039 = vst.msk [vmem:[%s1768_s25 + $0x50] sm:$0xff] %vm974_vm8, %v930_v12  ;;  %v897_v25 = vmax.f32 %v2003_v59, %v803_v16  ;;  %v896_v46 = vmax.f32 %v2004_v22, %v801_v19  ;;  %vm949_vm3 = vcmp.ne.f32.partialorder %v931_v11, 0.0  ;;  %vm948_vm4 = vcmp.ne.f32.partialorder %v930_v12, 0.0 }
 0x192   : > { %v967_v56 = vsel %vm949_vm3, 1, %v2007_v23  ;;  %v966_v63 = vsel %vm948_vm4, 1, %v2007_v23 }
 0x193   : > { %v993_v12 = vsel %vm974_vm8, %v967_v56, 0  ;;  %v991_v16 = vsel %vm974_vm8, %v966_v63, 0 }
 0x194   : > { %v839_v18 = vpop.permute.xlu1 %838  ;;  %v837_v20 = vpop.permute.xlu0 %836 }
 0x195   : > { %v915_v30 = vmax.f32 %v2005_v51, %v839_v18  ;;  %v914_v44 = vmax.f32 %v2006_v36, %v837_v20 }
 0x197   : > { %v933_v48 = vmax.f32 %v897_v25, %v915_v30  ;;  %v932_v24 = vmax.f32 %v896_v46, %v914_v44  ;;  %v2012_v25 = vmax.f32 %v1627_v2, 0.0  ;;  %v2013_v46 = vmax.f32 %v1633_v10, 0.0 }
 0x198   : > { %v807_v57 = vpop.permute.xlu1 %806  ;;  %v805_v26 = vpop.permute.xlu0 %804  ;;  %v2014_v30 = vmax.f32 %v1630_v6, 0.0  ;;  %v2015_v44 = vmax.f32 %v1636_v13, 0.0  ;;  %v992_v6 = vadd.s32 %v991_v16, %v984_v42 }
 0x199   : > { %1042 = vst.msk [vmem:[%s1768_s25 + $0x68] sm:$0xff] %vm974_vm8, %v933_v48  ;;  %1041 = vst.msk [vmem:[%s1768_s25 + $0x60] sm:$0xff] %vm974_vm8, %v932_v24  ;;  %v899_v28 = vmax.f32 %v2008_v49, %v807_v57  ;;  %v898_v37 = vmax.f32 %v2009_v53, %v805_v26  ;;  %vm951_vm5 = vcmp.ne.f32.partialorder %v933_v48, 0.0  ;;  %vm950_vm6 = vcmp.ne.f32.partialorder %v932_v24, 0.0 }
 0x19a   : > { %v969_v8 = vsel %vm951_vm5, 1, %v2007_v23  ;;  %v968_v11 = vsel %vm950_vm6, 1, %v2007_v23  ;;  %v988_v48 = vadd.s32 %v987_v4, %v980_v0  ;;  %v994_v26 = vadd.s32 %v993_v12, %v986_v40 }
 0x19b   : > { %v997_v24 = vsel %vm974_vm8, %v969_v8, 0  ;;  %v995_v9 = vsel %vm974_vm8, %v968_v11, 0 }
 0x19c   : > { %v843_v43 = vpop.permute.xlu1 %842  ;;  %v841_v27 = vpop.permute.xlu0 %840  ;;  %v998_v33 = vadd.s32 %v997_v24, %v990_v3  ;;  %v996_v29 = vadd.s32 %v995_v9, %v988_v48 }
 0x19d   : > { %v917_v38 = vmax.f32 %v2010_v31, %v843_v43  ;;  %v916_v1 = vmax.f32 %v2011_v32, %v841_v27 }
 0x19f   : > { %v935_v34 = vmax.f32 %v899_v28, %v917_v38  ;;  %v934_v45 = vmax.f32 %v898_v37, %v916_v1 }
 0x1a0   : > { %v811_v47 = vpop.permute.xlu1 %810  ;;  %v809_v52 = vpop.permute.xlu0 %808 }
 0x1a1   : > { %vm953_vm7 = vcmp.ne.f32.partialorder %v935_v34, 0.0  ;;  %1044 = vst.msk [vmem:[%s1768_s25 + $0x78] sm:$0xff] %vm974_vm8, %v935_v34  ;;  %vm952_vm9 = vcmp.ne.f32.partialorder %v934_v45, 0.0  ;;  %1043 = vst.msk [vmem:[%s1768_s25 + $0x70] sm:$0xff] %vm974_vm8, %v934_v45  ;;  %v901_v22 = vmax.f32 %v2012_v25, %v811_v47  ;;  %v900_v51 = vmax.f32 %v2013_v46, %v809_v52 }
 0x1a2   : > { %v971_v19 = vsel %vm953_vm7, 1, %v2007_v23  ;;  %v970_v18 = vsel %vm952_vm9, 1, %v2007_v23 }
 0x1a3   : > { %v1001_v2 = vsel %vm974_vm8, %v971_v19, 0  ;;  %v999_v21 = vsel %vm974_vm8, %v970_v18, 0 }
 0x1a4   : > { %v847_v20 = vpop.permute.xlu1 %846  ;;  %v845_v59 = vpop.permute.xlu0 %844  ;;  %v1002_v13 = vadd.s32 %v1001_v2, %v994_v26  ;;  %v1000_v39 = vadd.s32 %v999_v21, %v992_v6 }
 0x1a5   : > { %v919_v36 = vmax.f32 %v2014_v30, %v847_v20  ;;  %v918_v61 = vmax.f32 %v2015_v44, %v845_v59 }
 0x1a6   : > { %v1008_v49 = vadd.s32 %v1002_v13, %v1000_v39 }
 0x1a7   : > { %v937_v10 = vmax.f32 %v901_v22, %v919_v36  ;;  %v936_v57 = vmax.f32 %v900_v51, %v918_v61 }
 0x1a9   : > { %vm955_vm10 = vcmp.ne.f32.partialorder %v937_v10, 0.0  ;;  %1046 = vst.msk [vmem:[%s1768_s25 + $0x88] sm:$0xff] %vm974_vm8, %v937_v10  ;;  %vm954_vm11 = vcmp.ne.f32.partialorder %v936_v57, 0.0  ;;  %1045 = vst.msk [vmem:[%s1768_s25 + $0x80] sm:$0xff] %vm974_vm8, %v936_v57 }
 0x1aa   : > { %v973_v50 = vsel %vm955_vm10, 1, %v2007_v23  ;;  %v972_v7 = vsel %vm954_vm11, 1, %v2007_v23 }
 0x1ab   : > { %v1005_v15 = vsel %vm974_vm8, %v973_v50, 0  ;;  %v1003_v54 = vsel %vm974_vm8, %v972_v7, 0 }
 0x1ac   : > { %v1006_v35 = vadd.s32 %v1005_v15, %v998_v33  ;;  %v1004_v43 = vadd.s32 %v1003_v54, %v996_v29 }
 0x1ae   : > { %v1007_v27 = vadd.s32 %v1006_v35, %v1004_v43 }
 0x1b0   : > { %v1009_v28 = vadd.s32 %v1008_v49, %v1007_v27 }
 0x1b2   : > { %v1011_v53 = vshrl.u32 %v1009_v28, 16  ;;  %v1010_v37 = vand.u32 65535, %v1009_v28 }
 0x1b4   : > { %v1013_v31 = vcvt.s32.f32 %v1011_v53  ;;  %v1012_v38 = vcvt.s32.f32 %v1010_v37 }
 0x1b6   : > { %1016 = vadd.xlane.f32.xlu1 %v1013_v31  ;;  %1014 = vadd.xlane.f32.xlu0 %v1012_v38 }
 0x1de   : > { %v284_v32 = vpop.xlane.xlu0 %283 }
 0x1df   : > { %v286_v1 = vcvt.f32.s32 %v284_v32 }
 0x1e1   : > { %v287_v14 = vshll.u32 %v286_v1, 16 }
 0x1e2   : > { %v282_v60 = vpop.xlane.xlu0 %281 }
 0x1e3   : > { %v285_v23 = vcvt.f32.s32 %v282_v60 }
 0x1e5   : > { %v288_v5 = vadd.s32 %v287_v14, %v285_v23 }
 0x1e7   : > { %v289_v62 = vrot.slane %v288_v5, 4 }
 0x1e9   : > { %v290_v34 = vadd.s32 %v289_v62, %v288_v5 }
 0x1eb   : > { %v291_v45 = vrot.slane %v290_v34, 2 }
 0x1ed   : > { %v292_v17 = vadd.s32 %v291_v45, %v290_v34 }
 0x1ef   : > { %v293_v41 = vrot.slane %v292_v17, 1 }
 0x1f1   : > { %v294_v47 = vadd.s32 %v293_v41, %v292_v17 }
 0x1f3   : > { %1332 = vpush %v294_v47 }
 0x224   : > { %s1333_s27 = spop %1332 }
 0x243   : > { %v1017_v52 = vpop.xlane.xlu1 %1016  ;;  %v1015_v56 = vpop.xlane.xlu0 %1014 }
 0x244   : > { %v1019_v63 = vcvt.f32.s32 %v1017_v52  ;;  %v1018_v0 = vcvt.f32.s32 %v1015_v56 }
 0x246   : > { %v1020_v55 = vshll.u32 %v1019_v63, 16 }
 0x248   : > { %v1021_v40 = vadd.s32 %v1020_v55, %v1018_v0 }
 0x24a   : > { %v1022_v42 = vrot.slane %v1021_v40, 4 }
 0x24c   : > { %v1023_v58 = vadd.s32 %v1022_v42, %v1021_v40 }
 0x24e   : > { %v1024_v4 = vrot.slane %v1023_v58, 2 }
 0x250   : > { %v1025_v8 = vadd.s32 %v1024_v4, %v1023_v58 }
 0x252   : > { %v1026_v11 = vrot.slane %v1025_v8, 1 }
 0x254   : > { %v1027_v12 = vadd.s32 %v1026_v11, %v1025_v8 }
 0x256   : > { %1334 = vpush %v1027_v12 }
 0x287   : > { %s1335_s6 = spop %1334 }
 0x288   : > { %s1047_s7 = sadd.s32 %s1335_s6, %s1333_s27 }
 0x289   : > { %v1048_v16 = vstv %s1047_s7 }
 0x28a   : > { %1049 = vst [vmem:[%s255_s30] sm:$0xff] %v1048_v16 }
 0x28b PF: > { %s16_s18 = sadd.s32 1, %s1352_s18  }
 0x28c   : > { %p13_p4 = scmp.ge.s32.totalorder %s16_s18, 4  }
 0x28e   :  { %15 = sbr.rel (!%p13_p4) target bundleno = 1 (0x1), region = 81 }

// kernel: lenet5_forward.3
= control target key start
LH: loop header
LB: loop body
LE: loop exit
PB: predicated region body
PF: predicated region fallthrough
CT: control target
= control target key end

     0   :  { %s2413_s0 = inlined_call_operand.vmem [shape: f32[2,8,360], index: 0, kind: input, shape index: {}]   ;;  %s2414_s1 = inlined_call_operand.vmem [shape: f32[360,128], index: 1, kind: input, shape index: {}]   ;;  %s2415_s2 = inlined_call_operand.vmem [shape: f32[1,128], index: 2, kind: input, shape index: {}]   ;;  %s2416_s3 = inlined_call_operand.vmem [shape: f32[4,64,120], index: 3, kind: input, shape index: {}]   ;;  %s2417_s4 = inlined_call_operand.vmem [shape: f32[1,120], index: 4, kind: input, shape index: {}]   ;;  %s2418_s5 = inlined_call_operand.vmem [shape: f32[120,84], index: 5, kind: input, shape index: {}]   ;;  %s2419_s6 = inlined_call_operand.vmem [shape: f32[1,84], index: 6, kind: input, shape index: {}]   ;;  %s2420_s7 = inlined_call_operand.vmem [shape: f32[84,10], index: 7, kind: input, shape index: {}]   ;;  %s2421_s8 = inlined_call_operand.vmem [shape: f32[1,10], index: 8, kind: input, shape index: {}]   ;;  %s2422_s9 = inlined_call_operand.hbm [shape: f32[2,1,10], index: 9, kind: output, shape index: {0}]   ;;  %s2423_s10 = inlined_call_operand.vmem [shape: s32[16,128], index: 10, kind: output, shape index: {1}]  }
   0x1   :  { %2425 = sst [smem:[#allocation7_spill]] %s2413_s0 }
   0x2   :  { %2426 = sst [smem:[#allocation8_spill]] %s2414_s1 }
   0x3   :  { %16 = vsyncpa [#allocation3], 0 }
   0x4   :  { %18 = vsyncpa [#allocation3 + $0x1], 0  ;;  %s1902_s13 = smov 0   ;;  %s1904_s14 = smov 0  }
   0x5   :  { %s1906_s15 = smov 0   ;;  %s1908_s16 = smov 0  }
   0x6 LB: > { %2427 = sst [smem:[#allocation5_spill]] %s1835_s15  ;;  %s1923_s17 = sadd.s32 4294967295, %s1839_s16   ;;  %s1839_s16 = sphi %s1908_s16, %s2437_s16   ;;  %s1835_s15 = sphi %s1906_s15, %s2434_s15   ;;  %s1831_s14 = sphi %s1904_s14, %s2436_s14   ;;  %s1827_s13 = sphi %s1902_s13, %s2435_s13  }
   0x7   : > { %s1267_s18 = sadd.s32 4294967294, %s1839_s16   ;;  %s1927_s19 = sadd.s32 1, %s1839_s16  }
   0x8   : > { %s225_s20 = sadd.s32 1, %s1835_s15  ;;  %s222_s21 = ssub.s32 %s1839_s16, %s1927_s19 }
   0x9   : > { %p235_p0 = scmp.ne.s32.totalorder %s1835_s15, %s1831_s14  ;;  %p223_p1 = scmp.eq.s32.totalorder %s222_s21, 0 }
   0xa   : > { %p236_p2 = scmp.eq.s32.totalorder %s1923_s17, 1  ;;  %p241_p3 = scmp.ne.s32.totalorder %s1831_s14, %s1827_s13 }
   0xb   : > { %p242_p4 = scmp.eq.s32.totalorder %s1267_s18, 1  ;;  %p1270_p7 = scmp.ge.s32.totalorder %s1839_s16, 1 }
   0xc   : > { %s1938_s22 = scalar_select %p223_p1, %s1835_s15, %s225_s20  }
   0xd   : > { %p1940_p5 = por %p236_p2, %p235_p0  ;;  %p1944_p6 = por %p242_p4, %p241_p3 }
   0xe   : > { %2428 = sst [smem:[#allocation6_spill]] %s1938_s22  ;;  %p318_p8 = scmp.lt.s32.totalorder %s1839_s16, 3 }
  0x10   : > { %p319_p9 = pnand %p1270_p7, %p318_p8 }
  0x11   : > { %s2431_s1 = sld [smem:[#allocation8_spill]] (!%p319_p9)  ;;  %p359_p10 = scmp.lt.s32.totalorder (!%p319_p9), %s1923_s17, 1  ;;  %v1841_v7 = vmov (!%p319_p9), 0.0|0.0   ;;  %vm1842_vm0 = vmmov (!%p319_p9), 0   ;;  %v1843_v13 = vmov (!%p319_p9), 0.0   ;;  %vm423_vm1 = vcmask (!%p319_p9), 850944  }
  0x12   : > { %322 = sbr.rel (%p319_p9) target bundleno = 1114 (0x45a), region = 56  ;;  %1617 = vmatprep.subr.bf16.mxu1 (!%p319_p9), %v1841_v7  ;;  %1448 = vmatprep.mubr.msk.f32.mxu1 (!%p319_p9), %vm1842_vm0, %v1843_v13  ;;  %s2432_s0 = sld [smem:[#allocation7_spill]] (!%p319_p9)  ;;  %vm609_vm2 = vcmask (!%p319_p9), 523264   ;;  %vm579_vm3 = vcmask (!%p319_p9), 519168   ;;  %vm973_vm5 = vcmask (!%p319_p9), 982016   ;;  %vm936_vm6 = vcmask (!%p319_p9), 974848  }
  0x13   : > { %s1844_s26 = smov (!%p319_p9), 64   ;;  %vm1087_vm8 = vcmask (!%p319_p9), 1043456   ;;  %vm1083_vm9 = vcmask (!%p319_p9), 687104   ;;  %vm1050_vm10 = vcmask (!%p319_p9), 679936   ;;  %s351_s22 = sand.u32 (!%p319_p9), 1, %s1831_s14   ;;  %vm1162_vm12 = vcmask (!%p319_p9), 73728  }
  0x14   : > { %s352_s27 = scalar_lea.vmem (!%p319_p9), [#allocation2], %s351_s22 }
  0x15   : > { %s1185_s28 = sshll.u32 (!%p319_p9), %s352_s27, 4  ;;  %s2362_s28 = int_to_ptr.vmem [resolvable:$true] %s1185_s28 }
  0x16   : > { %s1777_s25 = scalar_lea.vmem (!%p319_p9), %s2362_s28, 16 }
  0x17   : > { %v387_v0 = vld [vmem:[%s2431_s1 + $0x80] sm:$0xff] (!%p319_p9)  ;;  %v388_v1 = vld [vmem:[%s2431_s1 + $0x88] sm:$0xff] (!%p319_p9)  ;;  %v389_v5 = vld [vmem:[%s2431_s1 + $0x90] sm:$0xff] (!%p319_p9)  ;;  %p1778_p11 = scmp.ne.s32.totalorder (!%p319_p9), %s2362_s28, %s1777_s25 }
  0x18   : > { %v371_v2 = vld [vmem:[%s2431_s1] sm:$0xff] (!%p319_p9)  ;;  %v1585_v3 = vpack.c.bf16 (!%p319_p9), %v388_v1, %v387_v0  ;;  %v372_v4 = vld [vmem:[%s2431_s1 + $0x8] sm:$0xff] (!%p319_p9)  ;;  %v390_v6 = vld [vmem:[%s2431_s1 + $0x98] sm:$0xff] (!%p319_p9) }
  0x19   : > { %v1587_v8 = vpack.c.bf16 %v372_v4, %v371_v2  ;;  %v1589_v9 = vpack.c.bf16 %v390_v6, %v389_v5  ;;  %v373_v10 = vld [vmem:[%s2431_s1 + $0x10] sm:$0xff]  ;;  %v374_v11 = vld [vmem:[%s2431_s1 + $0x18] sm:$0xff]  ;;  %v391_v12 = vld [vmem:[%s2431_s1 + $0xa0] sm:$0xff]  ;;  %s1987_s20 = scalar_select %p359_p10, %s1923_s17, 1 }
  0x1a   : > { %1586 = vmatprep.subr.bf16.mxu0 %v1585_v3  ;;  %v392_v14 = vld [vmem:[%s2431_s1 + $0xa8] sm:$0xff]  ;;  %v1591_v15 = vpack.c.bf16 %v374_v11, %v373_v10  ;;  %v403_v16 = vld [vmem:[%s2431_s1 + $0x100] sm:$0xff]  ;;  %v393_v22 = vld [vmem:[%s2431_s1 + $0xb0] sm:$0xff]  ;;  %p1779_p12 = pnand %p1778_p11, %p1940_p5 }
  0x1b   : > { %1588 = vmatpush3.bf16.msra.mxu0 %v1587_v8  ;;  %v404_v17 = vld [vmem:[%s2431_s1 + $0x108] sm:$0xff]  ;;  %v1593_v18 = vpack.c.bf16 %v392_v14, %v391_v12  ;;  %v375_v19 = vld [vmem:[%s2431_s1 + $0x20] sm:$0xff]  ;;  %v394_v23 = vld [vmem:[%s2431_s1 + $0xb8] sm:$0xff]  ;;  %s1726_s29 = smul.u32 24, %s1987_s20 }
  0x1c   : > { %1590 = vmatprep.subr.bf16.mxu0 %v1589_v9  ;;  %v376_v20 = vld [vmem:[%s2431_s1 + $0x28] sm:$0xff]  ;;  %v1618_v21 = vpack.c.bf16 %v404_v17, %v403_v16  ;;  %v405_v24 = vld [vmem:[%s2431_s1 + $0x110] sm:$0xff]  ;;  %v406_v25 = vld [vmem:[%s2431_s1 + $0x118] sm:$0xff]  ;;  %v1597_v30 = vpack.c.bf16 %v394_v23, %v393_v22  ;;  %p1780_p13 = pneg %p1779_p12 }
  0x1d   : > { %v1621_v26 = vpack.c.bf16 %v406_v25, %v405_v24  ;;  %v1595_v27 = vpack.c.bf16 %v376_v20, %v375_v19  ;;  %v407_v28 = vld [vmem:[%s2431_s1 + $0x120] sm:$0xff]  ;;  %v408_v29 = vld [vmem:[%s2431_s1 + $0x128] sm:$0xff]  ;;  %v377_v31 = vld [vmem:[%s2431_s1 + $0x30] sm:$0xff]  ;;  %s2036_s15 = scalar_lea.vmem %s2432_s0, %s1726_s29  ;;  %s1846_s0 = smov [#allocation2]  }
  0x1e   : > { %1619 = vmatpush3.bf16.msra.mxu1 %v1618_v21  ;;  %v378_v32 = vld [vmem:[%s2431_s1 + $0x38] sm:$0xff]  ;;  %v395_v33 = vld [vmem:[%s2431_s1 + $0xc0] sm:$0xff]  ;;  %v396_v34 = vld [vmem:[%s2431_s1 + $0xc8] sm:$0xff]  ;;  %v1624_v35 = vpack.c.bf16 %v408_v29, %v407_v28 }
  0x1f   : > { %1592 = vmatpush3.bf16.msra.mxu0 %v1591_v15  ;;  %1620 = vmatprep.subr.bf16.mxu1 %v1841_v7  ;;  %v1599_v36 = vpack.c.bf16 %v378_v32, %v377_v31  ;;  %v409_v37 = vld [vmem:[%s2431_s1 + $0x130] sm:$0xff]  ;;  %v410_v38 = vld [vmem:[%s2431_s1 + $0x138] sm:$0xff]  ;;  %v1601_v39 = vpack.c.bf16 %v396_v34, %v395_v33  ;;  %v379_v40 = vld [vmem:[%s2431_s1 + $0x40] sm:$0xff] }
  0x20   : > { %1594 = vmatprep.subr.bf16.mxu0 %v1593_v18  ;;  %v380_v41 = vld [vmem:[%s2431_s1 + $0x48] sm:$0xff]  ;;  %v397_v42 = vld [vmem:[%s2431_s1 + $0xd0] sm:$0xff]  ;;  %v398_v43 = vld [vmem:[%s2431_s1 + $0xd8] sm:$0xff]  ;;  %v1627_v45 = vpack.c.bf16 %v410_v38, %v409_v37 }
  0x21   : > { %v369_v44 = vld [vmem:[%s2036_s15 + $0x8] sm:$0xff]  ;;  %v1603_v46 = vpack.c.bf16 %v380_v41, %v379_v40  ;;  %v411_v47 = vld [vmem:[%s2431_s1 + $0x140] sm:$0xff]  ;;  %v1605_v49 = vpack.c.bf16 %v398_v43, %v397_v42  ;;  %v381_v50 = vld [vmem:[%s2431_s1 + $0x50] sm:$0xff]  ;;  %v1845_v41 = vmov 0  }
  0x22   : > { %1622 = vmatpush3.bf16.msra.mxu1 %v1621_v26  ;;  %491 = vmatprep.mubr.f32.mxu0 %v369_v44  ;;  %v412_v48 = vld [vmem:[%s2431_s1 + $0x148] sm:$0xff]  ;;  %v382_v51 = vld [vmem:[%s2431_s1 + $0x58] sm:$0xff]  ;;  %v399_v52 = vld [vmem:[%s2431_s1 + $0xe0] sm:$0xff] }
  0x23   : > { %1596 = vmatpush3.bf16.msra.mxu0 %v1595_v27  ;;  %1623 = vmatprep.subr.bf16.mxu1 %v1841_v7  ;;  %v400_v53 = vld [vmem:[%s2431_s1 + $0xe8] sm:$0xff]  ;;  %v1630_v54 = vpack.c.bf16 %v412_v48, %v411_v47  ;;  %v1607_v55 = vpack.c.bf16 %v382_v51, %v381_v50  ;;  %v413_v56 = vld [vmem:[%s2431_s1 + $0x150] sm:$0xff]  ;;  %v414_v57 = vld [vmem:[%s2431_s1 + $0x158] sm:$0xff] }
  0x24   : > { %1598 = vmatprep.subr.bf16.mxu0 %v1597_v30  ;;  %v1609_v58 = vpack.c.bf16 %v400_v53, %v399_v52  ;;  %v383_v59 = vld [vmem:[%s2431_s1 + $0x60] sm:$0xff]  ;;  %v384_v60 = vld [vmem:[%s2431_s1 + $0x68] sm:$0xff]  ;;  %v401_v61 = vld [vmem:[%s2431_s1 + $0xf0] sm:$0xff]  ;;  %v1633_v63 = vpack.c.bf16 %v414_v57, %v413_v56 }
  0x25   : > { %v402_v62 = vld [vmem:[%s2431_s1 + $0xf8] sm:$0xff]  ;;  %v1611_v0 = vpack.c.bf16 %v384_v60, %v383_v59  ;;  %v385_v2 = vld [vmem:[%s2431_s1 + $0x70] sm:$0xff]  ;;  %v415_v5 = vld [vmem:[%s2431_s1 + $0x160] sm:$0xff] }
  0x26   : > { %1625 = vmatpush3.bf16.msra.mxu1 %v1624_v35  ;;  %v1613_v1 = vpack.c.bf16 %v402_v62, %v401_v61  ;;  %v386_v3 = vld [vmem:[%s2431_s1 + $0x78] sm:$0xff]  ;;  %v370_v6 = vld [vmem:[%s2036_s15 + $0x10] sm:$0xff]  ;;  %v368_v8 = vld [vmem:[%s2036_s15] sm:$0xff]  ;;  %s1169_s15 = scalar_lea.sflag [#allocation3], %s351_s22  ;;  %s1781_s1 = sshll.u32 %s1846_s0, 4  ;;  %s1782_s1 = int_to_ptr.vmem [resolvable:$false] %s1781_s1 }
  0x27   : > { %1600 = vmatpush3.bf16.msra.mxu0 %v1599_v36  ;;  %1626 = vmatprep.subr.bf16.mxu1 %v1841_v7  ;;  %v1615_v4 = vpack.c.bf16 %v386_v3, %v385_v2  ;;  %v601_v9 = vld [vmem:[%s2416_s3] sm:$0xff]  ;;  %v602_v10 = vld [vmem:[%s2416_s3 + $0x8] sm:$0xff]  ;;  %v603_v11 = vld [vmem:[%s2416_s3 + $0x10] sm:$0xff]  ;;  %s1783_s11 = scalar_lea.vmem %s1782_s1, 32  ;;  %p1784_p0 = scmp.lt.s32.totalorder %s2362_s28, %s1782_s1 }
  0x28   : > { %1602 = vmatprep.subr.bf16.mxu0 %v1601_v39  ;;  %v1636_v12 = vpack.c.bf16 %v602_v10, %v601_v9  ;;  %v604_v14 = vld [vmem:[%s2416_s3 + $0x18] sm:$0xff]  ;;  %v605_v16 = vld [vmem:[%s2416_s3 + $0x20] sm:$0xff]  ;;  %v606_v17 = vld [vmem:[%s2416_s3 + $0x28] sm:$0xff]  ;;  %p1785_p1 = scmp.lt.s32.totalorder %s1783_s11, %s1777_s25 }
  0x29   : > { %v1639_v15 = vpack.c.bf16 %v604_v14, %v603_v11  ;;  %v1642_v18 = vpack.c.bf16 %v606_v17, %v605_v16  ;;  %v607_v19 = vld [vmem:[%s2416_s3 + $0x30] sm:$0xff]  ;;  %v608_v20 = vld [vmem:[%s2416_s3 + $0x38] sm:$0xff]  ;;  %v1273_v26 = vld [vmem:[%s2415_s2] ss:$0 sm:$0xff] }
  0x2a   : > { %1628 = vmatpush3.bf16.msra.mxu1 %v1627_v45  ;;  %v1645_v22 = vpack.c.bf16 %v608_v20, %v607_v19  ;;  %v1276_v33 = vld [vmem:[%s2416_s3 + $0x40] sm:$0xff]  ;;  %v1277_v34 = vld [vmem:[%s2416_s3 + $0x48] sm:$0xff]  ;;  %v1278_v38 = vld [vmem:[%s2416_s3 + $0x50] sm:$0xff]  ;;  %p1786_p2 = por %p1785_p1, %p1784_p0 }
  0x2b   : > { %1604 = vmatpush3.bf16.msra.mxu0 %v1603_v46  ;;  %1629 = vmatprep.subr.bf16.mxu1 %v1841_v7  ;;  %v1648_v36 = vpack.c.bf16 %v1277_v34, %v1276_v33  ;;  %v1279_v39 = vld [vmem:[%s2416_s3 + $0x58] sm:$0xff]  ;;  %v1280_v44 = vld [vmem:[%s2416_s3 + $0x60] sm:$0xff]  ;;  %v1281_v45 = vld [vmem:[%s2416_s3 + $0x68] sm:$0xff] }
  0x2c   : > { %1606 = vmatprep.subr.bf16.mxu0 %v1605_v49  ;;  %v1651_v40 = vpack.c.bf16 %v1279_v39, %v1278_v38  ;;  %v1654_v50 = vpack.c.bf16 %v1281_v45, %v1280_v44  ;;  %v1282_v51 = vld [vmem:[%s2416_s3 + $0x70] sm:$0xff]  ;;  %v1283_v52 = vld [vmem:[%s2416_s3 + $0x78] sm:$0xff]  ;;  %v1289_v61 = vld [vmem:[%s2416_s3 + $0xa0] sm:$0xff]  ;;  %p1787_p3 = pnand %p1786_p2, %p1780_p13 }
  0x2d   : > { %v1657_v53 = vpack.c.bf16 %v1283_v52, %v1282_v51  ;;  %v1288_v59 = vld [vmem:[%s2416_s3 + $0x98] sm:$0xff]  ;;  %v1290_v62 = vld [vmem:[%s2416_s3 + $0xa8] sm:$0xff]  ;;  %v1294_v3 = vld [vmem:[%s2416_s3 + $0xc0] sm:$0xff] }
  0x2e   : > { %1631 = vmatpush3.bf16.msra.mxu1 %v1630_v54  ;;  %v1285_v54 = vld [vmem:[%s2416_s3 + $0x80] sm:$0xff]  ;;  %v1297_v9 = vld [vmem:[%s2416_s3 + $0xd8] sm:$0xff]  ;;  %v958_v20 = vld [vmem:[%s2418_s5 + $0x8] sm:$0xff] }
  0x2f   : > { %1608 = vmatpush3.bf16.msra.mxu0 %v1607_v55  ;;  %1632 = vmatprep.subr.bf16.mxu1 %v1841_v7  ;;  %v1286_v55 = vld [vmem:[%s2416_s3 + $0x88] sm:$0xff]  ;;  %v1298_v11 = vld [vmem:[%s2416_s3 + $0xe0] sm:$0xff]  ;;  %v1301_v16 = vld [vmem:[%s2416_s3 + $0xf8] sm:$0xff] }
  0x30   : > { %1610 = vmatprep.subr.bf16.mxu0 %v1609_v58  ;;  %v1660_v56 = vpack.c.bf16 %v1286_v55, %v1285_v54  ;;  %v1287_v58 = vld [vmem:[%s2416_s3 + $0x90] sm:$0xff]  ;;  %v957_v19 = vld [vmem:[%s2418_s5] sm:$0xff]  ;;  %v970_v38 = vld [vmem:[%s2418_s5 + $0x68] sm:$0xff] }
  0x31   : > { %v1663_v60 = vpack.c.bf16 %v1288_v59, %v1287_v58  ;;  %v967_v34 = vld [vmem:[%s2418_s5 + $0x50] sm:$0xff]  ;;  %v600_v54 = vld [vmem:[%s2417_s4] sm:$0x1] }
  0x32   : > { %1634 = vmatpush3.bf16.msra.mxu1 %v1633_v63  ;;  %v1666_v63 = vpack.c.bf16 %v1290_v62, %v1289_v61 }
  0x33   : > { %1612 = vmatpush3.bf16.msra.mxu0 %v1611_v0  ;;  %1446 = vmatprep.subr.mxu1 %v1843_v13  ;;  %v1291_v0 = vld [vmem:[%s2416_s3 + $0xb0] sm:$0xff] }
  0x34   : > { %1614 = vmatprep.subr.bf16.mxu0 %v1613_v1  ;;  %v1292_v1 = vld [vmem:[%s2416_s3 + $0xb8] sm:$0xff] }
  0x35   : > { %v1669_v2 = vpack.c.bf16 %v1292_v1, %v1291_v0  ;;  %v1071_v1 = vld [vmem:[%s2420_s7] sm:$0xff] }
  0x36   : > { %1447 = vmatpush3.msra.mxu1 %v415_v5 }
  0x37   : > { %1616 = vmatpush3.bf16.msra.mxu0 %v1615_v4  ;;  %1449 = vmatmul.mubr.msk.f32.vlgmr.msra.gmra.mrb[0].mxu1 %vm423_vm1, %v370_v6  ;;  %v1295_v4 = vld [vmem:[%s2416_s3 + $0xc8] sm:$0xff] }
  0x38   : > { %1635 = vmatprep.subr.bf16.mxu1 %v1841_v7  ;;  %1467 = vmatprep.mubr.msk.f32.mxu1 %vm1842_vm0, %v1843_v13  ;;  %v1672_v5 = vpack.c.bf16 %v1295_v4, %v1294_v3  ;;  %v1073_v3 = vld [vmem:[%s2420_s7 + $0x10] sm:$0xff] }
  0x39   : > { %1683 = vmatprep.subr.bf16.mxu0 %v1841_v7  ;;  %1637 = vmatpush3.bf16.msra.mxu1 %v1636_v12  ;;  %v1299_v12 = vld [vmem:[%s2416_s3 + $0xe8] sm:$0xff] }
  0x3a   : > { %492 = vmatmul.mubr.f32.vlgmr.msra.gmra.mrb[0].mxu0 %v368_v8  ;;  %1638 = vmatprep.subr.bf16.mxu1 %v1841_v7  ;;  %v1296_v8 = vld [vmem:[%s2416_s3 + $0xd0] sm:$0xff]  ;;  %v1678_v14 = vpack.c.bf16 %v1299_v12, %v1298_v11  ;;  %v1078_v12 = vld [vmem:[%s2420_s7 + $0x38] sm:$0xff] }
  0x3b   : > { %1557 = vmatprep.mubr.msk.f32.mxu0 %vm1842_vm0, %v1843_v13  ;;  %v1675_v10 = vpack.c.bf16 %v1297_v9, %v1296_v8  ;;  %v1075_v8 = vld [vmem:[%s2420_s7 + $0x20] sm:$0xff]  ;;  %v1076_v9 = vld [vmem:[%s2420_s7 + $0x28] sm:$0xff]  ;;  %v1077_v11 = vld [vmem:[%s2420_s7 + $0x30] sm:$0xff] }
  0x3d   : > { %1640 = vmatpush3.bf16.msra.mxu1 %v1639_v15  ;;  %v1300_v15 = vld [vmem:[%s2416_s3 + $0xf0] sm:$0xff] }
  0x3e   : > { %1641 = vmatprep.subr.bf16.mxu1 %v1841_v7  ;;  %v1681_v17 = vpack.c.bf16 %v1301_v16, %v1300_v15  ;;  %v1079_v15 = vld [vmem:[%s2420_s7 + $0x40] sm:$0xff]  ;;  %v1080_v16 = vld [vmem:[%s2420_s7 + $0x48] sm:$0xff] }
  0x41   : > { %1643 = vmatpush3.bf16.msra.mxu1 %v1642_v18 }
  0x42   : > { %1644 = vmatprep.subr.bf16.mxu1 %v1841_v7 }
  0x45   : > { %1646 = vmatpush3.bf16.msra.mxu1 %v1645_v22  ;;  %v1684_v22 = vpack.c.bf16 %v958_v20, %v957_v19 }
  0x46   : > { %1647 = vmatprep.subr.bf16.mxu1 %v1841_v7 }
  0x47   : > { %1685 = vmatpush3.bf16.msra.mxu0 %v1684_v22 }
  0x48   : > { %1686 = vmatprep.subr.bf16.mxu0 %v1841_v7 }
 0x10a   : > { %v563_v21 = vpop.f32.mrb[0].mxu1 }
 0x10b   : > { %v1450_v23 = vpop.f32.mrb[1].mxu1 }
 0x10c   : > { %v960_v23 = vld [vmem:[%s2418_s5 + $0x18] sm:$0xff] }
 0x10d   : > { %v1341_v24 = vpop.f32.mrb[0].mxu0 }
 0x10e   : > { %v1342_v25 = vpop.f32.mrb[1].mxu0 }
 0x10f   : > { %v1343_v27 = vadd.f32 %v1342_v25, %v1341_v24  ;;  %v961_v25 = vld [vmem:[%s2418_s5 + $0x20] sm:$0xff] }
 0x111   : > { %v494_v28 = vadd.f32 %v1343_v27, %v1273_v26  ;;  %v962_v26 = vld [vmem:[%s2418_s5 + $0x28] sm:$0xff] }
 0x112   : > { %v1690_v27 = vpack.c.bf16 %v962_v26, %v961_v25 }
 0x113   : > { %v564_v29 = vadd.f32 %v563_v21, %v494_v28  ;;  %v959_v21 = vld [vmem:[%s2418_s5 + $0x10] sm:$0xff] }
 0x114   : > { %v1687_v24 = vpack.c.bf16 %v960_v23, %v959_v21  ;;  %v963_v28 = vld [vmem:[%s2418_s5 + $0x30] sm:$0xff] }
 0x115   : > { %v567_v30 = vmax.f32 %v564_v29, 0.0  ;;  %v964_v29 = vld [vmem:[%s2418_s5 + $0x38] sm:$0xff] }
 0x116   : > { %1688 = vmatpush3.bf16.msra.mxu0 %v1687_v24 }
 0x117   : > { %569 = vrot.lane.b32.xlu0 %v567_v30, %s1844_s26  ;;  %1689 = vmatprep.subr.bf16.mxu0 %v1841_v7  ;;  %s1306_s26 = sshll.u32 %s1923_s17, 4  ;;  %s1272_s17 = sshll.u32 %s1987_s20, 3 }
 0x118   : > { %s2360_s18 = scalar_lea.hbm %s2422_s9, %s1306_s26 }
 0x11a   : > { %1691 = vmatpush3.bf16.msra.mxu0 %v1690_v27 }
 0x11b   : > { %1692 = vmatprep.subr.bf16.mxu0 %v1841_v7 }
 0x189   : > { %v570_v31 = vpop.permute.xlu0 %569 }
 0x18a   : > { %v572_v32 = vmax.f32 %v567_v30, %v570_v31  ;;  %v1693_v30 = vpack.c.bf16 %v964_v29, %v963_v28  ;;  %v965_v31 = vld [vmem:[%s2418_s5 + $0x40] sm:$0xff] }
 0x18c   : > { %v574_v35 = vrot.slane %v572_v32, 4  ;;  %1694 = vmatpush3.bf16.msra.mxu0 %v1693_v30 }
 0x18d   : > { %1695 = vmatprep.subr.bf16.mxu0 %v1841_v7 }
 0x18e   : > { %v2152_v37 = vmax.f32 %v572_v32, %v574_v35  ;;  %v966_v32 = vld [vmem:[%s2418_s5 + $0x48] sm:$0xff]  ;;  %v968_v35 = vld [vmem:[%s2418_s5 + $0x58] sm:$0xff] }
 0x18f   : > { %v1696_v33 = vpack.c.bf16 %v966_v32, %v965_v31 }
 0x190   : > { %1468 = vmatmul.mubr.msk.f32.vlgmr.msra.gmra.mrb[2].mxu1 %vm609_vm2, %v2152_v37  ;;  %vm577_vm4 = vcmp.ne.f32.partialorder %v2152_v37, 0.0  ;;  %v693_v57 = vrot.slane %v2152_v37, 1  ;;  %v776_v6 = vrot.slane %v2152_v37, 2  ;;  %v859_v18 = vrot.slane %v2152_v37, 3  ;;  %v969_v37 = vld [vmem:[%s2418_s5 + $0x60] sm:$0xff] }
 0x191   : > { %1649 = vmatpush3.bf16.msra.mxu1 %v1648_v36  ;;  %v578_v42 = vsel %vm577_vm4, 1, %v1845_v41  ;;  %1486 = vmatprep.mubr.msk.f32.mxu1 %vm1842_vm0, %v1843_v13  ;;  %v1699_v36 = vpack.c.bf16 %v968_v35, %v967_v34  ;;  %v1702_v39 = vpack.c.bf16 %v970_v38, %v969_v37 }
 0x192   : > { %1650 = vmatprep.subr.bf16.mxu1 %v1841_v7  ;;  %v580_v43 = vsel %vm579_vm3, %v578_v42, 0  ;;  %1697 = vmatpush3.bf16.msra.mxu0 %v1696_v33 }
 0x193   : > { %v582_v46 = vshrl.u32 %v580_v43, 16  ;;  %v581_v47 = vand.u32 65535, %v580_v43  ;;  %1698 = vmatprep.subr.bf16.mxu0 %v1841_v7 }
 0x195   : > { %1652 = vmatpush3.bf16.msra.mxu1 %v1651_v40  ;;  %v584_v48 = vcvt.s32.f32 %v582_v46  ;;  %v583_v49 = vcvt.s32.f32 %v581_v47  ;;  %v971_v40 = vld [vmem:[%s2418_s5 + $0x70] sm:$0xff] }
 0x196   : > { %1653 = vmatprep.subr.bf16.mxu1 %v1841_v7  ;;  %1700 = vmatpush3.bf16.msra.mxu0 %v1699_v36 }
 0x197   : > { %587 = vadd.xlane.f32.xlu0 %v584_v48  ;;  %585 = vadd.xlane.f32.xlu1 %v583_v49 }
 0x198   : > { %1701 = vmatprep.subr.bf16.mxu0 %v1841_v7 }
 0x199   : > { %1655 = vmatpush3.bf16.msra.mxu1 %v1654_v50 }
 0x19a   : > { %1656 = vmatprep.subr.bf16.mxu1 %v1841_v7  ;;  %1703 = vmatpush3.bf16.msra.mxu0 %v1702_v39 }
 0x19b   : > { %1555 = vmatprep.subr.mxu0 %v1843_v13 }
 0x19d   : > { %1658 = vmatpush3.bf16.msra.mxu1 %v1657_v53 }
 0x19e   : > { %1659 = vmatprep.subr.bf16.mxu1 %v1841_v7  ;;  %1556 = vmatpush3.msra.mxu0 %v971_v40 }
 0x19f   : > { %1704 = vmatprep.subr.bf16.mxu0 %v1841_v7 }
 0x1a0   : > { %1487 = vmatmul.mubr.msk.f32.vlgmr.msra.gmra.mrb[2].mxu1 %vm609_vm2, %v693_v57 }
 0x1a1   : > { %1661 = vmatpush3.bf16.msra.mxu1 %v1660_v56  ;;  %1505 = vmatprep.mubr.msk.f32.mxu1 %vm1842_vm0, %v1843_v13 }
 0x1a2   : > { %1662 = vmatprep.subr.bf16.mxu1 %v1841_v7 }
 0x1a5   : > { %1664 = vmatpush3.bf16.msra.mxu1 %v1663_v60 }
 0x1a6   : > { %1665 = vmatprep.subr.bf16.mxu1 %v1841_v7 }
 0x1a9   : > { %1667 = vmatpush3.bf16.msra.mxu1 %v1666_v63 }
 0x1aa   : > { %1668 = vmatprep.subr.bf16.mxu1 %v1841_v7 }
 0x1ad   : > { %1670 = vmatpush3.bf16.msra.mxu1 %v1669_v2  ;;  %v1072_v2 = vld [vmem:[%s2420_s7 + $0x8] sm:$0xff] }
 0x1ae   : > { %1671 = vmatprep.subr.bf16.mxu1 %v1841_v7  ;;  %v1705_v4 = vpack.c.bf16 %v1072_v2, %v1071_v1 }
 0x1b0   : > { %1506 = vmatmul.mubr.msk.f32.vlgmr.msra.gmra.mrb[2].mxu1 %vm609_vm2, %v776_v6 }
 0x1b1   : > { %1673 = vmatpush3.bf16.msra.mxu1 %v1672_v5  ;;  %1524 = vmatprep.mubr.msk.f32.mxu1 %vm1842_vm0, %v1843_v13  ;;  %v1074_v5 = vld [vmem:[%s2420_s7 + $0x18] sm:$0xff] }
 0x1b2   : > { %1674 = vmatprep.subr.bf16.mxu1 %v1841_v7  ;;  %v1708_v6 = vpack.c.bf16 %v1074_v5, %v1073_v3 }
 0x1b5   : > { %1676 = vmatpush3.bf16.msra.mxu1 %v1675_v10  ;;  %v1711_v10 = vpack.c.bf16 %v1076_v9, %v1075_v8 }
 0x1b6   : > { %1677 = vmatprep.subr.bf16.mxu1 %v1841_v7 }
 0x1b9   : > { %1679 = vmatpush3.bf16.msra.mxu1 %v1678_v14  ;;  %v1714_v14 = vpack.c.bf16 %v1078_v12, %v1077_v11 }
 0x1ba   : > { %1680 = vmatprep.subr.bf16.mxu1 %v1841_v7 }
 0x1bd   : > { %1682 = vmatpush3.bf16.msra.mxu1 %v1681_v17  ;;  %v1717_v17 = vpack.c.bf16 %v1080_v16, %v1079_v15 }
 0x1c0   : > { %1525 = vmatmul.mubr.msk.f32.vlgmr.msra.gmra.mrb[2].mxu1 %vm609_vm2, %v859_v18  ;;  %v1081_v18 = vld [vmem:[%s2420_s7 + $0x50] sm:$0xf] }
 0x224   : > { %v588_v42 = vpop.xlane.xlu0 %587  ;;  %v586_v43 = vpop.xlane.xlu1 %585 }
 0x225   : > { %v590_v44 = vcvt.f32.s32 %v588_v42  ;;  %v589_v46 = vcvt.f32.s32 %v586_v43 }
 0x227   : > { %v591_v45 = vshll.u32 %v590_v44, 16 }
 0x229   : > { %v592_v47 = vadd.s32 %v591_v45, %v589_v46 }
 0x22b   : > { %v593_v48 = vrot.slane %v592_v47, 4 }
 0x22d   : > { %v594_v49 = vadd.s32 %v593_v48, %v592_v47 }
 0x22f   : > { %v595_v50 = vrot.slane %v594_v49, 2 }
 0x231   : > { %v596_v51 = vadd.s32 %v595_v50, %v594_v49 }
 0x233   : > { %v597_v52 = vrot.slane %v596_v51, 1 }
 0x235   : > { %v598_v53 = vadd.s32 %v597_v52, %v596_v51  ;;  %v1082_v52 = vld [vmem:[%s2421_s8] sm:$0x1] }
 0x237   : > { %1727 = vpush %v598_v53 }
 0x268   : > { %s2353_s29 = spop %1727 }
 0x293   : > { %v928_v55 = vpop.f32.mrb[2].mxu1 }
 0x294   : > { %v1719_v56 = vadd.f32 %v928_v55, %v600_v54  ;;  %v1526_v57 = vpop.f32.mrb[3].mxu1 }
 0x296   : > { %v933_v58 = vmax.f32 %v1719_v56, 0.0 }
 0x298   : > { %vm934_vm7 = vcmp.ne.f32.partialorder %v933_v58, 0.0  ;;  %1558 = vmatmul.mubr.msk.f32.vlgmr.msra.gmra.mrb[2].mxu0 %vm973_vm5, %v933_v58 }
 0x299   : > { %v935_v59 = vsel %vm934_vm7, 1, %v1845_v41  ;;  %1582 = vmatprep.mubr.msk.f32.mxu0 %vm1842_vm0, %v1843_v13  ;;  %1706 = vmatpush3.bf16.msra.mxu0 %v1705_v4 }
 0x29a   : > { %v937_v60 = vsel %vm936_vm6, %v935_v59, 0  ;;  %1707 = vmatprep.subr.bf16.mxu0 %v1841_v7 }
 0x29b   : > { %v939_v61 = vshrl.u32 %v937_v60, 16  ;;  %v938_v63 = vand.u32 65535, %v937_v60 }
 0x29d   : > { %v941_v62 = vcvt.s32.f32 %v939_v61  ;;  %v940_v0 = vcvt.s32.f32 %v938_v63  ;;  %1709 = vmatpush3.bf16.msra.mxu0 %v1708_v6 }
 0x29e   : > { %1710 = vmatprep.subr.bf16.mxu0 %v1841_v7 }
 0x29f   : > { %944 = vadd.xlane.f32.xlu1 %v941_v62 }
 0x2a1   : > { %1712 = vmatpush3.bf16.msra.mxu0 %v1711_v10 }
 0x2a2   : > { %1713 = vmatprep.subr.bf16.mxu0 %v1841_v7 }
 0x2a3   : > { %942 = vadd.xlane.f32.xlu1 %v940_v0 }
 0x2a5   : > { %1715 = vmatpush3.bf16.msra.mxu0 %v1714_v14 }
 0x2a6   : > { %1716 = vmatprep.subr.bf16.mxu0 %v1841_v7 }
 0x2a9   : > { %1718 = vmatpush3.bf16.msra.mxu0 %v1717_v17 }
 0x2aa   : > { %1580 = vmatprep.subr.mxu0 %v1843_v13  ;;  %v972_v13 = vld [vmem:[%s2419_s6] sm:$0x1] }
 0x2ad   : > { %1581 = vmatpush3.msk.msra.mxu0 %vm1087_vm8, %v1081_v18 }
 0x32c   : > { %v945_v19 = vpop.xlane.xlu1 %944 }
 0x32d   : > { %v947_v7 = vcvt.f32.s32 %v945_v19 }
 0x32f   : > { %v948_v21 = vshll.u32 %v947_v7, 16 }
 0x330   : > { %v943_v20 = vpop.xlane.xlu1 %942 }
 0x331   : > { %v946_v22 = vcvt.f32.s32 %v943_v20 }
 0x333   : > { %v949_v23 = vadd.s32 %v948_v21, %v946_v22 }
 0x335   : > { %v950_v24 = vrot.slane %v949_v23, 4 }
 0x337   : > { %v951_v25 = vadd.s32 %v950_v24, %v949_v23 }
 0x339   : > { %v952_v26 = vrot.slane %v951_v25, 2 }
 0x33b   : > { %v953_v27 = vadd.s32 %v952_v26, %v951_v25 }
 0x33d   : > { %v954_v28 = vrot.slane %v953_v27, 1 }
 0x33f   : > { %v955_v29 = vadd.s32 %v954_v28, %v953_v27 }
 0x341   : > { %1729 = vpush %v955_v29 }
 0x36b   : > { %v1043_v30 = vpop.f32.mrb[2].mxu0 }
 0x36c   : > { %v1044_v31 = vadd.f32 %v1043_v30, %v972_v13  ;;  %v1559_v32 = vpop.f32.mrb[3].mxu0 }
 0x36e   : > { %v1047_v33 = vmax.f32 %v1044_v31, 0.0 }
 0x370   : > { %vm1048_vm11 = vcmp.ne.f32.partialorder %v1047_v33, 0.0  ;;  %1583 = vmatmul.mubr.msk.f32.vlgmr.msra.gmra.mrb[4].mxu0 %vm1083_vm9, %v1047_v33 }
 0x371   : > { %v1049_v34 = vsel %vm1048_vm11, 1, %v1845_v41 }
 0x372   : > { %v1051_v35 = vsel %vm1050_vm10, %v1049_v34, 0  ;;  %s2355_s30 = spop %1729 }
 0x373   : > { %v1053_v36 = vshrl.u32 %v1051_v35, 16  ;;  %v1052_v38 = vand.u32 65535, %v1051_v35  ;;  %s1164_s21 = sadd.s32 %s2355_s30, %s2353_s29 }
 0x375   : > { %v1055_v37 = vcvt.s32.f32 %v1053_v36  ;;  %v1054_v39 = vcvt.s32.f32 %v1052_v38 }
 0x377   : > { %1058 = vadd.xlane.f32.xlu1 %v1055_v37 }
 0x37b   : > { %1056 = vadd.xlane.f32.xlu1 %v1054_v39 }
 0x404   : > { %v1059_v40 = vpop.xlane.xlu1 %1058 }
 0x405   : > { %v1061_v42 = vcvt.f32.s32 %v1059_v40 }
 0x407   : > { %v1062_v44 = vshll.u32 %v1061_v42, 16 }
 0x408   : > { %v1057_v43 = vpop.xlane.xlu1 %1056 }
 0x409   : > { %v1060_v45 = vcvt.f32.s32 %v1057_v43 }
 0x40b   : > { %v1063_v46 = vadd.s32 %v1062_v44, %v1060_v45 }
 0x40d   : > { %v1064_v47 = vrot.slane %v1063_v46, 4 }
 0x40f   : > { %v1065_v48 = vadd.s32 %v1064_v47, %v1063_v46 }
 0x411   : > { %v1066_v49 = vrot.slane %v1065_v48, 2 }
 0x413   : > { %v1067_v50 = vadd.s32 %v1066_v49, %v1065_v48 }
 0x415   : > { %v1068_v41 = vrot.slane %v1067_v50, 1 }
 0x417   : > { %v1069_v51 = vadd.s32 %v1068_v41, %v1067_v50 }
 0x419   : > { %1731 = vpush %v1069_v51 }
 0x443   : > { %v1157_v53 = vpop.f32.mrb[4].mxu0 }
 0x444   : > { %v1158_v54 = vadd.f32 %v1157_v53, %v1082_v52  ;;  %v1584_v55 = vpop.f32.mrb[5].mxu0 }
 0x446   : > { %v1161_v56 = vmax.f32 %v1158_v54, 0.0 }
 0x448   : > { %1163 = vst.msk [vmem:[%s352_s27] sm:$0x1] %vm1162_vm12, %v1161_v56 }
 0x449   : > { %1790 = shalt.err (!%p1787_p3)
}
 0x44a   : > { %s1791_s22 = scalar_lea.hbm %s2360_s18, 16  ;;  %s1795_s0 = scalar_lea.hbm %s2422_s9, 32 }
 0x44b   : > { %p1792_p4 = scmp.ne.s32.totalorder %s2360_s18, %s1791_s22  ;;  %p1796_p9 = scmp.lt.u32.totalorder %s2360_s18, %s2422_s9 }
 0x44c   : > { %p1797_p10 = scmp.lt.u32.totalorder %s1795_s0, %s1791_s22  ;;  %p1799_p12 = scmp.lt.u32.totalorder %s1791_s22, %s2360_s18 }
 0x44d   : > { %p1793_p7 = pnand %p1792_p4, %p1940_p5 }
 0x44e   : > { %p1798_p11 = por %p1797_p10, %p1796_p9 }
 0x44f   : > { %p1794_p8 = pneg %p1793_p7 }
 0x450   : > { %p1800_p13 = por %p1799_p12, %p1798_p11 }
 0x452   : > { %p1801_p0 = pnand %p1800_p13, %p1794_p8 }
 0x454   : > { %1804 = shalt.err (!%p1801_p0)
}
 0x455   : > { %1733 = dma.vmem_to_hbm [thread:$0]  (%p1940_p5), %s2362_s28, 16, %s2360_s18, %s1169_s15  }
 0x456   : > { %s367_s26 = scalar_lea.vmem %s2423_s10, %s1272_s17  ;;  %s1732_s27 = spop %1731 }
 0x457   : > { %s1165_s0 = sadd.s32 %s1732_s27, %s1164_s21 }
 0x458   : > { %v1166_v57 = vstv %s1165_s0 }
 0x459   : > { %1167 = vst [vmem:[%s367_s26] sm:$0xff] %v1166_v57 }
 0x45a PF: > { %p1739_p1 = scmp.ge.s32.totalorder %s1839_s16, 2  ;;  %s1200_s23 = sand.u32 1, %s1827_s13  }
 0x45b   : > { %s1201_s22 = scalar_lea.sflag [#allocation3], %s1200_s23 }
 0x45c   : > { %p1736_p2 = pnand %p1739_p1, %p1944_p6 }
 0x45e   : > { %1822 = dma.done.wait (!%p1736_p2), %s1201_s22, 16  }
 0x45f   : > { %1824 = vsyncadd (!%p1736_p2), %s1201_s22, 4294967280  ;;  %s2433_s20 = sld [smem:[#allocation5_spill]]  ;;  %s2434_s15 = sld [smem:[#allocation6_spill]] }
 0x460   : > { %p21_p5 = scmp.ge.s32.totalorder %s1927_s19, 4   ;;  %s2435_s13 = smov %s1831_s14 }
 0x461   : > { %s2437_s16 = smov %s1927_s19 }
 0x462   :  { %23 = sbr.rel (!%p21_p5) target bundleno = 6 (0x6), region = 106 }
 0x465   : > { %s2436_s14 = smov %s2433_s20 }
 0x469   :  { %1212 = vsyncpa [#allocation3], 1 }
 0x46a   :  { %1214 = vsyncpa [#allocation3 + $0x1], 1 }

</bundles_post_ra>
